<compile_context>
chip_gen: v7x
topology: tpu7x:2x2x1
jax: 0.10.0
libtpu: 0.0.40
codegen_flags: <defaults>
</compile_context>

<pallas_src>
import jax
import jax.numpy as jnp
from jax.experimental import pallas as pl
from jax.experimental.pallas import tpu as pltpu

IN_FEATURES = 28 * 28   # 784, fixed by the module's forward (view(-1, 784))
HIDDEN = 256            # module spec: n = 256 (multiple of 128 -> lane-dense)
BATCH = 500             # module spec: maxnum = 500
TILE_B = 256            # MXU-filling batch tile; grid = cdiv(500, 256) = 2


def mlp_kernel(x_ref, w1_ref, w2_ref, o_ref):
    # x_ref : (TB, 784) f32   w1_ref : (784, n) bf16   w2_ref : (n, n) bf16
    # o_ref : (TB, n)  f32
    x = x_ref[...].astype(jnp.bfloat16)            # in-kernel pack, hidden under MXU
    h = jnp.dot(x, w1_ref[...], preferred_element_type=jnp.float32)
    h = jnp.maximum(h, 0.0)                        # ReLU after fc1 (f32 VPU)
    y = jnp.dot(h.astype(w2_ref.dtype), w2_ref[...],
                preferred_element_type=jnp.float32)
    o_ref[...] = jnp.maximum(y, 0.0).astype(o_ref.dtype)   # ReLU after fc2


def net1_forward(x, w1_t, w2_t, *, tile_b=TILE_B):
    """x: (B, 784) f32; w1_t: (784, n) bf16; w2_t: (n, n) bf16. Returns (B, n) f32."""
    B, D = x.shape
    n = w1_t.shape[1]
    assert D == IN_FEATURES and w2_t.shape == (n, n)
    assert n % 128 == 0, "hidden dim must be lane-dense (multiple of 128)"

    nb = pl.cdiv(B, tile_b)                         # last block is masked boundary
    flops = 2 * nb * tile_b * (D * n + n * n)
    bytes_accessed = x.size * 4 + w1_t.size * 2 + w2_t.size * 2 + B * n * 4

    # NOTE: at n=256 resident bf16 weights are <0.6 MiB; default double
    # buffering is fine.  If n scales up, add pipeline_mode=pl.Buffered(1) to
    # the two constant-index weight BlockSpecs — at roughly half the n
    # threshold on v7x (64 MiB VMEM) vs v5e/v6e (128 MiB).
    return pl.pallas_call(
        mlp_kernel,
        out_shape=jax.ShapeDtypeStruct((B, n), jnp.float32),
        grid_spec=pltpu.PrefetchScalarGridSpec(
            num_scalar_prefetch=0,
            grid=(nb,),
            in_specs=[
                pl.BlockSpec((tile_b, D), lambda i: (i, 0)),   # x tile over batch
                pl.BlockSpec((D, n), lambda i: (0, 0)),        # full W1^T resident
                pl.BlockSpec((n, n), lambda i: (0, 0)),        # full W2^T resident
            ],
            out_specs=pl.BlockSpec((tile_b, n), lambda i: (i, 0)),
        ),
        compiler_params=pltpu.CompilerParams(
            dimension_semantics=("parallel",)),
        cost_estimate=pl.CostEstimate(
            flops=flops, transcendentals=0, bytes_accessed=bytes_accessed),
    )(x, w1_t, w2_t)


def init_params(key, n):
    # Deterministic synthetic init (Kaiming-uniform-ish scale like nn.Linear).
    # PyTorch stores W as (out, in) f32; we keep the transposed (in, out)
    # layout and cast to bf16 ONCE here (weights are constant across calls).
    k1, k2 = jax.random.split(key)
    bound1 = 1.0 / jnp.sqrt(IN_FEATURES)
    bound2 = 1.0 / jnp.sqrt(n)
    w1_t = jax.random.uniform(k1, (IN_FEATURES, n), jnp.float32, -bound1, bound1)
    w2_t = jax.random.uniform(k2, (n, n), jnp.float32, -bound2, bound2)
    return w1_t.astype(jnp.bfloat16), w2_t.astype(jnp.bfloat16)


if __name__ == "__main__":
    key = jax.random.PRNGKey(0)
    kx, kp = jax.random.split(key)

    # Input shaped like flattened MNIST images: (B, 1, 28, 28) -> view(-1, 784)
    x_img = jax.random.normal(kx, (BATCH, 1, 28, 28), jnp.float32)
    x = x_img.reshape(-1, IN_FEATURES)

    w1_t, w2_t = init_params(kp, HIDDEN)

    out = jax.block_until_ready(net1_forward(x, w1_t, w2_t))

    # Reference with identical bf16 casts and f32 accumulation (same math path).
    xb = x.astype(jnp.bfloat16)
    h_ref = jnp.maximum(jnp.dot(xb, w1_t, preferred_element_type=jnp.float32), 0.0)
    ref = jnp.maximum(jnp.dot(h_ref.astype(jnp.bfloat16), w2_t,
                              preferred_element_type=jnp.float32), 0.0)

    assert out.shape == (BATCH, HIDDEN)
    assert bool(jnp.all(jnp.isfinite(out)))          # masked boundary block is clean
    assert jnp.allclose(out, ref, atol=1e-2, rtol=1e-2)

    print("KERNEL_OK")
</pallas_src>

<mosaic_0001>
module attributes {stable_mosaic.version = 11 : i64} {
  func.func @mlp_kernel(%arg0: i32, %arg1: memref<256x784xf32, #tpu.memory_space<vmem>>, %arg2: memref<784x256xbf16, #tpu.memory_space<vmem>>, %arg3: memref<256x256xbf16, #tpu.memory_space<vmem>>, %arg4: memref<256x256xf32, #tpu.memory_space<vmem>>) attributes {dimension_semantics = [#tpu.dimension_semantics<parallel>], iteration_bounds = array<i64: 2>, scalar_prefetch = 0 : i64, scratch_operands = 0 : i64, tpu.core_type = #tpu.core_type<tc>, window_params = [{transform_indices = @transform_0, window_bounds = array<i64: 256, 784>}, {pipeline_mode = #tpu.pipeline_mode<synchronous>, transform_indices = @transform_1, window_bounds = array<i64: 784, 256>}, {pipeline_mode = #tpu.pipeline_mode<synchronous>, transform_indices = @transform_2, window_bounds = array<i64: 256, 256>}, {transform_indices = @transform_3, window_bounds = array<i64: 256, 256>}]} {
    %c0 = arith.constant 0 : index
    %c0_0 = arith.constant 0 : index
    %0 = vector.load %arg1[%c0, %c0_0] : memref<256x784xf32, #tpu.memory_space<vmem>>, vector<256x784xf32>
    %1 = arith.truncf %0 : vector<256x784xf32> to vector<256x784xbf16>
    %c0_1 = arith.constant 0 : index
    %c0_2 = arith.constant 0 : index
    %2 = vector.load %arg2[%c0_1, %c0_2] : memref<784x256xbf16, #tpu.memory_space<vmem>>, vector<784x256xbf16>
    %cst = arith.constant dense<0.000000e+00> : vector<256x256xf32>
    %3 = tpu.matmul %1, %2, %cst {dimension_numbers = #tpu.dot_dimension_numbers<[1], [0], [0], [1], [0, 0, 1, 1], [], []>} : vector<256x784xbf16>, vector<784x256xbf16>, vector<256x256xf32> -> vector<256x256xf32>
    %cst_3 = arith.constant 0.000000e+00 : f32
    %4 = vector.broadcast %cst_3 : f32 to vector<256x256xf32>
    %5 = arith.maximumf %3, %4 : vector<256x256xf32>
    %6 = arith.truncf %5 : vector<256x256xf32> to vector<256x256xbf16>
    %c0_4 = arith.constant 0 : index
    %c0_5 = arith.constant 0 : index
    %7 = vector.load %arg3[%c0_4, %c0_5] : memref<256x256xbf16, #tpu.memory_space<vmem>>, vector<256x256xbf16>
    %cst_6 = arith.constant dense<0.000000e+00> : vector<256x256xf32>
    %8 = tpu.matmul %6, %7, %cst_6 {dimension_numbers = #tpu.dot_dimension_numbers<[1], [0], [0], [1], [0, 0, 1, 1], [], []>} : vector<256x256xbf16>, vector<256x256xbf16>, vector<256x256xf32> -> vector<256x256xf32>
    %cst_7 = arith.constant 0.000000e+00 : f32
    %9 = vector.broadcast %cst_7 : f32 to vector<256x256xf32>
    %10 = arith.maximumf %8, %9 : vector<256x256xf32>
    %c0_8 = arith.constant 0 : index
    %c0_9 = arith.constant 0 : index
    %11 = vector.load %arg4[%c0_8, %c0_9] : memref<256x256xf32, #tpu.memory_space<vmem>>, vector<256x256xf32>
    tpu.vector_store %arg4[%c0_8, %c0_9], %10 {strides = array<i32>} : memref<256x256xf32, #tpu.memory_space<vmem>>, vector<256x256xf32>,
    return
  }
  func.func @transform_0(%arg0: i32) -> (i32, i32) {
    %c0_i32 = arith.constant 0 : i32
    %c0_i32_0 = arith.constant 0 : i32
    return %arg0, %c0_i32 : i32, i32
  }
  func.func @transform_1(%arg0: i32) -> (i32, i32) {
    %c0_i32 = arith.constant 0 : i32
    %c0_i32_0 = arith.constant 0 : i32
    %c0_i32_1 = arith.constant 0 : i32
    return %c0_i32, %c0_i32_0 : i32, i32
  }
  func.func @transform_2(%arg0: i32) -> (i32, i32) {
    %c0_i32 = arith.constant 0 : i32
    %c0_i32_0 = arith.constant 0 : i32
    %c0_i32_1 = arith.constant 0 : i32
    return %c0_i32, %c0_i32_0 : i32, i32
  }
  func.func @transform_3(%arg0: i32) -> (i32, i32) {
    %c0_i32 = arith.constant 0 : i32
    %c0_i32_0 = arith.constant 0 : i32
    return %arg0, %c0_i32 : i32, i32
  }
}

</mosaic_0001>

<bundles_post_ra>
// kernel: tpu_custom_call.1
= control target key start
LH: loop header
LB: loop body
LE: loop exit
PB: predicated region body
PF: predicated region fallthrough
CT: control target
= control target key end

     0   :  { %8 = vsyncpa [#allocation3], 0  ;;  %s4516_s0 = inlined_call_operand.vmem [shape: f32[500,784], index: 0, kind: input, shape index: {}]   ;;  %s4517_s1 = inlined_call_operand.vmem [shape: bf16[784,256], index: 1, kind: input, shape index: {}]   ;;  %s4518_s2 = inlined_call_operand.vmem [shape: bf16[256,256], index: 2, kind: input, shape index: {}]   ;;  %s4519_s3 = inlined_call_operand.hbm [shape: f32[500,256], index: 3, kind: output, shape index: {}]  }
   0x1   :  { %10 = vsyncpa [#allocation3 + $0x1], 0  ;;  %s3360_s12 = smov 0   ;;  %s3362_s13 = smov 0  }
   0x2   :  { %s3364_s14 = smov 0   ;;  %s3366_s15 = smov 0  }
   0x3 LB: > { %s3381_s16 = sadd.s32 4294967295, %s3334_s15   ;;  %s2644_s17 = sadd.s32 4294967294, %s3334_s15   ;;  %s3334_s15 = sphi %s3366_s15, %s4543_s15   ;;  %s3330_s14 = sphi %s3364_s14, %s4542_s14   ;;  %s3326_s13 = sphi %s3362_s13, %s4541_s13   ;;  %s3322_s12 = sphi %s3360_s12, %s4540_s12  }
   0x4   : > { %s3385_s18 = sadd.s32 1, %s3334_s15   ;;  %s91_s19 = sadd.s32 1, %s3330_s14 }
   0x5   : > { %s88_s20 = ssub.s32 %s3334_s15, %s3385_s18  ;;  %p101_p0 = scmp.ne.s32.totalorder %s3330_s14, %s3326_s13 }
   0x6   : > { %p89_p1 = scmp.eq.s32.totalorder %s88_s20, 0  ;;  %p102_p2 = scmp.eq.s32.totalorder %s3381_s16, 1 }
   0x7   : > { %p107_p3 = scmp.ne.s32.totalorder %s3326_s13, %s3322_s12  ;;  %p108_p4 = scmp.eq.s32.totalorder %s2644_s17, 1 }
   0x8   : > { %s3396_s21 = scalar_select %p89_p1, %s3330_s14, %s91_s19  }
   0x9   : > { %p3398_p5 = por %p102_p2, %p101_p0  ;;  %p3402_p6 = por %p108_p4, %p107_p3 }
   0xa   : > { %p2647_p7 = scmp.ge.s32.totalorder %s3334_s15, 1  ;;  %p152_p8 = scmp.lt.s32.totalorder %s3334_s15, 3 }
   0xc   : > { %p153_p9 = pnand %p2647_p7, %p152_p8 }
   0xe   : > { %156 = sbr.rel (%p153_p9) target bundleno = 866 (0x362), region = 32 }
  0x15   : > { %v3411_v0 = vld [vmem:[%s4517_s1 + $0x104] ss:$8 sps:$4 sm:$0xff]   ;;  %v3416_v1 = vld [vmem:[%s4517_s1 + $0x100] ss:$8 sps:$4 sm:$0xff]   ;;  %v3422_v2 = vld [vmem:[%s4517_s1 + $0x114] ss:$8 sps:$4 sm:$0xff]  }
  0x16   : > { %1372 = vmatprep.subr.bf16.mxu0 %v3411_v0  ;;  %v3428_v3 = vld [vmem:[%s4517_s1 + $0x110] ss:$8 sps:$4 sm:$0xff]   ;;  %v3434_v4 = vld [vmem:[%s4517_s1 + $0x124] ss:$8 sps:$4 sm:$0xff]   ;;  %s3437_s7 = sshll.u32 %s3381_s16, 5  ;;  %vm1130_vm0 = vcmask 130048  }
  0x17   : > { %1373 = vmatpush1.bf16.msra.mxu0 %v3416_v1  ;;  %v3443_v5 = vld [vmem:[%s4517_s1 + $0x120] ss:$8 sps:$4 sm:$0xff]   ;;  %p188_p10 = scmp.lt.s32.totalorder %s3437_s7, 62  ;;  %v3450_v6 = vld [vmem:[%s4517_s1 + $0x134] ss:$8 sps:$4 sm:$0xff]   ;;  %s2569_s8 = ssub.s32 (%p3398_p5), 63, %s3437_s7 }
  0x18   : > { %1374 = vmatprep.subr.bf16.mxu0 %v3422_v2  ;;  %v3456_v7 = vld [vmem:[%s4517_s1 + $0x130] ss:$8 sps:$4 sm:$0xff]   ;;  %v3463_v8 = vld [vmem:[%s4517_s1 + $0x144] ss:$8 sps:$4 sm:$0xff]   ;;  %v3469_v9 = vld [vmem:[%s4517_s1 + $0x140] ss:$8 sps:$4 sm:$0xff]  }
  0x19   : > { %s189_s20 = scalar_select %p188_p10, %s3437_s7, 62  ;;  %v3475_v10 = vld [vmem:[%s4517_s1 + $0x154] ss:$8 sps:$4 sm:$0xff]   ;;  %v3481_v11 = vld [vmem:[%s4517_s1 + $0x150] ss:$8 sps:$4 sm:$0xff]  }
  0x1a   : > { %v3492_v12 = vld [vmem:[%s4517_s1 + $0x164] ss:$8 sps:$4 sm:$0xff]   ;;  %v3127_v14 = vld [vmem:[%s4517_s1] ss:$8 sps:$4 sm:$0xff]   ;;  %v3512_v18 = vld [vmem:[%s4517_s1 + $0x174] ss:$8 sps:$4 sm:$0xff]  }
  0x1b   : > { %1375 = vmatpush1.bf16.msra.mxu0 %v3428_v3  ;;  %s3035_s28 = smul.u32 56, %s189_s20  ;;  %v3125_v13 = vld [vmem:[%s4517_s1 + $0x4] ss:$8 sps:$4 sm:$0xff]   ;;  %v3505_v16 = vld [vmem:[%s4517_s1 + $0x160] ss:$8 sps:$4 sm:$0xff]   ;;  %p2570_p11 = scmp.lt.s32.totalorder (%p3398_p5), %s2569_s8, 32 }
  0x1c   : > { %1376 = vmatprep.subr.bf16.mxu0 %v3434_v4  ;;  %1179 = vmatprep.subr.bf16.mxu1 %v3125_v13  ;;  %v3131_v20 = vld [vmem:[%s4517_s1 + $0x14] ss:$8 sps:$4 sm:$0xff]   ;;  %v3133_v21 = vld [vmem:[%s4517_s1 + $0x10] ss:$8 sps:$4 sm:$0xff]   ;;  %v3529_v23 = vld [vmem:[%s4517_s1 + $0x184] ss:$8 sps:$4 sm:$0xff]  }
  0x1d   : > { %s3486_s9 = scalar_lea.vmem %s4516_s0, %s3035_s28  ;;  %1180 = vmatpush1.bf16.msra.mxu1 %v3127_v14  ;;  %v3524_v22 = vld [vmem:[%s4517_s1 + $0x170] ss:$8 sps:$4 sm:$0xff]   ;;  %v3137_v24 = vld [vmem:[%s4517_s1 + $0x24] ss:$8 sps:$4 sm:$0xff]   ;;  %v3139_v25 = vld [vmem:[%s4517_s1 + $0x20] ss:$8 sps:$4 sm:$0xff]  }
  0x1e   : > { %v209_v15 = vld [vmem:[%s3486_s9 + $0x18] sm:$0xff]  ;;  %v216_v17 = vld [vmem:[%s3486_s9 + $0x50] sm:$0xff]  ;;  %1181 = vmatprep.subr.bf16.mxu1 %v3131_v20  ;;  %v3542_v26 = vld [vmem:[%s4517_s1 + $0x180] ss:$8 sps:$4 sm:$0xff]  }
  0x1f   : > { %1377 = vmatpush1.bf16.msra.mxu0 %v3443_v5  ;;  %v433_v19 = vpack.c.bf16 %v216_v17, %v209_v15  ;;  %v3547_v27 = vld [vmem:[%s4517_s1 + $0x194] ss:$8 sps:$4 sm:$0xff]   ;;  %v3145_v29 = vld [vmem:[%s4517_s1 + $0x30] ss:$8 sps:$4 sm:$0xff]   ;;  %v3149_v31 = vld [vmem:[%s4517_s1 + $0x44] ss:$8 sps:$4 sm:$0xff]  }
  0x20   : > { %1378 = vmatprep.subr.bf16.mxu0 %v3450_v6  ;;  %v3143_v28 = vld [vmem:[%s4517_s1 + $0x34] ss:$8 sps:$4 sm:$0xff]   ;;  %v3560_v30 = vld [vmem:[%s4517_s1 + $0x190] ss:$8 sps:$4 sm:$0xff]   ;;  %v3569_v32 = vld [vmem:[%s4517_s1 + $0x1a4] ss:$8 sps:$4 sm:$0xff]  }
  0x21   : > { %1404 = vmatprep.mubr.bf16.mxu0 %v433_v19  ;;  %1182 = vmatpush1.bf16.msra.mxu1 %v3133_v21  ;;  %v3151_v33 = vld [vmem:[%s4517_s1 + $0x40] ss:$8 sps:$4 sm:$0xff]   ;;  %v3155_v35 = vld [vmem:[%s4517_s1 + $0x54] ss:$8 sps:$4 sm:$0xff]   ;;  %v3157_v37 = vld [vmem:[%s4517_s1 + $0x50] ss:$8 sps:$4 sm:$0xff]  }
  0x22   : > { %1183 = vmatprep.subr.bf16.mxu1 %v3137_v24  ;;  %v3578_v34 = vld [vmem:[%s4517_s1 + $0x1a0] ss:$8 sps:$4 sm:$0xff]   ;;  %v3587_v36 = vld [vmem:[%s4517_s1 + $0x1b4] ss:$8 sps:$4 sm:$0xff]   ;;  %v3161_v38 = vld [vmem:[%s4517_s1 + $0x64] ss:$8 sps:$4 sm:$0xff]  }
  0x23   : > { %1379 = vmatpush1.bf16.msra.mxu0 %v3456_v7  ;;  %v3599_v39 = vld [vmem:[%s4517_s1 + $0x1b0] ss:$8 sps:$4 sm:$0xff]   ;;  %v3605_v40 = vld [vmem:[%s4517_s1 + $0x1c4] ss:$8 sps:$4 sm:$0xff]   ;;  %v3163_v41 = vld [vmem:[%s4517_s1 + $0x60] ss:$8 sps:$4 sm:$0xff]  }
  0x24   : > { %1380 = vmatprep.subr.bf16.mxu0 %v3463_v8  ;;  %v3167_v42 = vld [vmem:[%s4517_s1 + $0x74] ss:$8 sps:$4 sm:$0xff]   ;;  %v3617_v43 = vld [vmem:[%s4517_s1 + $0x1c0] ss:$8 sps:$4 sm:$0xff]   ;;  %v3169_v45 = vld [vmem:[%s4517_s1 + $0x70] ss:$8 sps:$4 sm:$0xff]  }
  0x25   : > { %1184 = vmatpush1.bf16.msra.mxu1 %v3139_v25  ;;  %v3623_v44 = vld [vmem:[%s4517_s1 + $0x1d4] ss:$8 sps:$4 sm:$0xff]   ;;  %v3173_v46 = vld [vmem:[%s4517_s1 + $0x84] ss:$8 sps:$4 sm:$0xff]   ;;  %v3635_v47 = vld [vmem:[%s4517_s1 + $0x1d0] ss:$8 sps:$4 sm:$0xff]  }
  0x26   : > { %1185 = vmatprep.subr.bf16.mxu1 %v3143_v28  ;;  %v3641_v48 = vld [vmem:[%s4517_s1 + $0x1e4] ss:$8 sps:$4 sm:$0xff]   ;;  %v3175_v49 = vld [vmem:[%s4517_s1 + $0x80] ss:$8 sps:$4 sm:$0xff]   ;;  %v3179_v50 = vld [vmem:[%s4517_s1 + $0x94] ss:$8 sps:$4 sm:$0xff]  }
  0x27   : > { %1381 = vmatpush1.bf16.msra.mxu0 %v3469_v9  ;;  %v3653_v51 = vld [vmem:[%s4517_s1 + $0x1e0] ss:$8 sps:$4 sm:$0xff]   ;;  %v3659_v52 = vld [vmem:[%s4517_s1 + $0x1f4] ss:$8 sps:$4 sm:$0xff]   ;;  %v3664_v53 = vld [vmem:[%s4517_s1 + $0x1f0] ss:$8 sps:$4 sm:$0xff]  }
  0x28   : > { %1382 = vmatprep.subr.bf16.mxu0 %v3475_v10  ;;  %v208_v54 = vld [vmem:[%s3486_s9 + $0x10] sm:$0xff]  ;;  %v215_v56 = vld [vmem:[%s3486_s9 + $0x48] sm:$0xff]  ;;  %v230_v60 = vld [vmem:[%s3486_s9 + $0xc0] sm:$0xff] }
  0x29   : > { %1186 = vmatpush1.bf16.msra.mxu1 %v3145_v29  ;;  %v3181_v55 = vld [vmem:[%s4517_s1 + $0x90] ss:$8 sps:$4 sm:$0xff]   ;;  %v3185_v57 = vld [vmem:[%s4517_s1 + $0xa4] ss:$8 sps:$4 sm:$0xff]   ;;  %v3187_v61 = vld [vmem:[%s4517_s1 + $0xa0] ss:$8 sps:$4 sm:$0xff]   ;;  %v432_v62 = vpack.c.bf16 %v215_v56, %v208_v54 }
  0x2a   : > { %1187 = vmatprep.subr.bf16.mxu1 %v3149_v31  ;;  %v3130_v58 = vld [vmem:[%s4517_s1 + $0x204] ss:$8 sps:$4 sm:$0xff]   ;;  %v3191_v63 = vld [vmem:[%s4517_s1 + $0xb4] ss:$8 sps:$4 sm:$0xff]   ;;  %v3128_v13 = vld [vmem:[%s4517_s1 + $0x200] ss:$8 sps:$4 sm:$0xff]  }
  0x2b   : > { %1383 = vmatpush1.bf16.msra.mxu0 %v3481_v11  ;;  %v223_v59 = vld [vmem:[%s3486_s9 + $0x88] sm:$0xff]  ;;  %v3136_v15 = vld [vmem:[%s4517_s1 + $0x214] ss:$8 sps:$4 sm:$0xff]   ;;  %v3134_v17 = vld [vmem:[%s4517_s1 + $0x210] ss:$8 sps:$4 sm:$0xff]  }
  0x2c   : > { %1384 = vmatprep.subr.bf16.mxu0 %v3492_v12  ;;  %v440_v14 = vpack.c.bf16 %v230_v60, %v223_v59  ;;  %v222_v19 = vld [vmem:[%s3486_s9 + $0x80] sm:$0xff]  ;;  %v3193_v20 = vld [vmem:[%s4517_s1 + $0xb0] ss:$8 sps:$4 sm:$0xff]   ;;  %v243_v54 = vld [vmem:[%s3486_s9 + $0x128] sm:$0xff] }
  0x2d   : > { %1188 = vmatpush1.bf16.msra.mxu1 %v3151_v33  ;;  %v229_v21 = vld [vmem:[%s3486_s9 + $0xb8] sm:$0xff]  ;;  %v3197_v24 = vld [vmem:[%s4517_s1 + $0xc4] ss:$8 sps:$4 sm:$0xff]   ;;  %v244_v29 = vld [vmem:[%s3486_s9 + $0x130] sm:$0xff] }
  0x2e   : > { %1189 = vmatprep.subr.bf16.mxu1 %v3155_v35  ;;  %v3142_v25 = vld [vmem:[%s4517_s1 + $0x224] ss:$8 sps:$4 sm:$0xff]   ;;  %v237_v28 = vld [vmem:[%s3486_s9 + $0xf8] sm:$0xff]  ;;  %v3199_v31 = vld [vmem:[%s4517_s1 + $0xc0] ss:$8 sps:$4 sm:$0xff]   ;;  %v439_v33 = vpack.c.bf16 %v229_v21, %v222_v19 }
  0x2f   : > { %1385 = vmatpush1.bf16.msra.mxu0 %v3505_v16  ;;  %v3203_v35 = vld [vmem:[%s4517_s1 + $0xd4] ss:$8 sps:$4 sm:$0xff]   ;;  %v3154_v56 = vld [vmem:[%s4517_s1 + $0x244] ss:$8 sps:$4 sm:$0xff]   ;;  %v3211_v60 = vld [vmem:[%s4517_s1 + $0xe0] ss:$8 sps:$4 sm:$0xff]  }
  0x30   : > { %1386 = vmatprep.subr.bf16.mxu0 %v3512_v18  ;;  %v213_v19 = vld [vmem:[%s3486_s9 + $0x38] sm:$0xff]  ;;  %v228_v21 = vld [vmem:[%s3486_s9 + $0xb0] sm:$0xff] }
  0x31   : > { %1190 = vmatpush1.bf16.msra.mxu1 %v3157_v37  ;;  %v3140_v37 = vld [vmem:[%s4517_s1 + $0x220] ss:$8 sps:$4 sm:$0xff]  }
  0x32   : > { %1191 = vmatprep.subr.bf16.mxu1 %v3161_v38  ;;  %v447_v38 = vpack.c.bf16 %v244_v29, %v237_v28  ;;  %v257_v28 = vld [vmem:[%s3486_s9 + $0x198] sm:$0xff]  ;;  %v3166_v29 = vld [vmem:[%s4517_s1 + $0x264] ss:$8 sps:$4 sm:$0xff]  }
  0x33   : > { %1387 = vmatpush1.bf16.msra.mxu0 %v3524_v22 }
  0x34   : > { %1388 = vmatprep.subr.bf16.mxu0 %v3529_v23 }
  0x35   : > { %1192 = vmatpush1.bf16.msra.mxu1 %v3163_v41  ;;  %v3148_v41 = vld [vmem:[%s4517_s1 + $0x234] ss:$8 sps:$4 sm:$0xff]  }
  0x36   : > { %1193 = vmatprep.subr.bf16.mxu1 %v3167_v42  ;;  %v3205_v42 = vld [vmem:[%s4517_s1 + $0xd0] ss:$8 sps:$4 sm:$0xff]  }
  0x37   : > { %1389 = vmatpush1.bf16.msra.mxu0 %v3542_v26 }
  0x38   : > { %1390 = vmatprep.subr.bf16.mxu0 %v3547_v27 }
  0x39   : > { %1194 = vmatpush1.bf16.msra.mxu1 %v3169_v45  ;;  %v3146_v45 = vld [vmem:[%s4517_s1 + $0x230] ss:$8 sps:$4 sm:$0xff]  }
  0x3a   : > { %1195 = vmatprep.subr.bf16.mxu1 %v3173_v46  ;;  %v3209_v46 = vld [vmem:[%s4517_s1 + $0xe4] ss:$8 sps:$4 sm:$0xff]  }
  0x3b   : > { %1391 = vmatpush1.bf16.msra.mxu0 %v3560_v30 }
  0x3c   : > { %1392 = vmatprep.subr.bf16.mxu0 %v3569_v32 }
  0x3d   : > { %1196 = vmatpush1.bf16.msra.mxu1 %v3175_v49  ;;  %v207_v49 = vld [vmem:[%s3486_s9 + $0x8] sm:$0xff] }
  0x3e   : > { %1197 = vmatprep.subr.bf16.mxu1 %v3179_v50  ;;  %v236_v50 = vld [vmem:[%s3486_s9 + $0xf0] sm:$0xff] }
  0x3f   : > { %1393 = vmatpush1.bf16.msra.mxu0 %v3578_v34 }
  0x40   : > { %1394 = vmatprep.subr.bf16.mxu0 %v3587_v36 }
  0x41   : > { %1198 = vmatpush1.bf16.msra.mxu1 %v3181_v55  ;;  %v214_v55 = vld [vmem:[%s3486_s9 + $0x40] sm:$0xff] }
  0x42   : > { %1199 = vmatprep.subr.bf16.mxu1 %v3185_v57  ;;  %v251_v57 = vld [vmem:[%s3486_s9 + $0x168] sm:$0xff]  ;;  %v431_v59 = vpack.c.bf16 %v214_v55, %v207_v49  ;;  %v264_v55 = vld [vmem:[%s3486_s9 + $0x1d0] sm:$0xff] }
  0x43   : > { %1395 = vmatpush1.bf16.msra.mxu0 %v3599_v39  ;;  %v227_v49 = vld [vmem:[%s3486_s9 + $0xa8] sm:$0xff] }
  0x44   : > { %1396 = vmatprep.subr.bf16.mxu0 %v3605_v40  ;;  %1211 = vmatprep.mubr.bf16.mxu1 %v431_v59 }
  0x45   : > { %1200 = vmatpush1.bf16.msra.mxu1 %v3187_v61  ;;  %v446_v61 = vpack.c.bf16 %v243_v54, %v236_v50  ;;  %v242_v50 = vld [vmem:[%s3486_s9 + $0x120] sm:$0xff]  ;;  %v3170_v54 = vld [vmem:[%s4517_s1 + $0x270] ss:$8 sps:$4 sm:$0xff]  }
  0x46   : > { %1201 = vmatprep.subr.bf16.mxu1 %v3191_v63  ;;  %v3152_v63 = vld [vmem:[%s4517_s1 + $0x240] ss:$8 sps:$4 sm:$0xff]  }
  0x47   : > { %1397 = vmatpush1.bf16.msra.mxu0 %v3617_v43 }
  0x48   : > { %1398 = vmatprep.subr.bf16.mxu0 %v3623_v44 }
  0x49   : > { %1202 = vmatpush1.bf16.msra.mxu1 %v3193_v20  ;;  %v221_v20 = vld [vmem:[%s3486_s9 + $0x78] sm:$0xff] }
  0x4a   : > { %1203 = vmatprep.subr.bf16.mxu1 %v3197_v24  ;;  %v3158_v24 = vld [vmem:[%s4517_s1 + $0x250] ss:$8 sps:$4 sm:$0xff]  }
  0x4b   : > { %1399 = vmatpush1.bf16.msra.mxu0 %v3635_v47 }
  0x4c   : > { %1400 = vmatprep.subr.bf16.mxu0 %v3641_v48 }
  0x4d   : > { %1204 = vmatpush1.bf16.msra.mxu1 %v3199_v31  ;;  %v265_v31 = vld [vmem:[%s3486_s9 + $0x1d8] sm:$0xff] }
  0x4e   : > { %1205 = vmatprep.subr.bf16.mxu1 %v3203_v35 }
  0x4f   : > { %1401 = vmatpush1.bf16.msra.mxu0 %v3653_v51 }
  0x50   : > { %1402 = vmatprep.subr.bf16.mxu0 %v3659_v52 }
  0x51   : > { %1206 = vmatpush1.bf16.msra.mxu1 %v3205_v42 }
  0x52   : > { %1207 = vmatprep.subr.bf16.mxu1 %v3209_v46  ;;  %v220_v46 = vld [vmem:[%s3486_s9 + $0x70] sm:$0xff] }
  0x53   : > { %1403 = vmatpush1.bf16.msra.mxu0 %v3664_v53  ;;  %v437_v59 = vpack.c.bf16 %v227_v49, %v220_v46 }
  0x54   : > { %1565 = vmatprep.subr.bf16.mxu0 %v3130_v58  ;;  %v258_v58 = vld [vmem:[%s3486_s9 + $0x1a0] sm:$0xff] }
  0x55   : > { %1208 = vmatpush1.bf16.msra.mxu1 %v3211_v60 }
  0x56   : > { %1405 = vmatmul.mubr.bf16.vlgmr.msra.gmra.mrb[0].mxu0 %v432_v62  ;;  %v3215_v62 = vld [vmem:[%s4517_s1 + $0xf4] ss:$8 sps:$4 sm:$0xff]  }
  0x57   : > { %1566 = vmatpush1.bf16.msra.mxu0 %v3128_v13  ;;  %1414 = vmatprep.mubr.bf16.mxu0 %v440_v14  ;;  %v454_v13 = vpack.c.bf16 %v258_v58, %v251_v57  ;;  %v3160_v14 = vld [vmem:[%s4517_s1 + $0x254] ss:$8 sps:$4 sm:$0xff]   ;;  %v3178_v57 = vld [vmem:[%s4517_s1 + $0x284] ss:$8 sps:$4 sm:$0xff]  }
  0x58   : > { %1567 = vmatprep.subr.bf16.mxu0 %v3136_v15  ;;  %v3217_v15 = vld [vmem:[%s4517_s1 + $0xf0] ss:$8 sps:$4 sm:$0xff]   ;;  %1209 = vmatprep.subr.bf16.mxu1 %v3215_v62  ;;  %v286_v58 = vld [vmem:[%s3486_s9 + $0x280] sm:$0xff] }
  0x59   : > { %1210 = vmatpush1.bf16.msra.mxu1 %v3217_v15  ;;  %v3182_v15 = vld [vmem:[%s4517_s1 + $0x290] ss:$8 sps:$4 sm:$0xff]  }
  0x5a   : > { %2811 = vmatprep.subr.bf16.mxu1 %v3411_v0  ;;  %v235_v0 = vld [vmem:[%s3486_s9 + $0xe8] sm:$0xff] }
  0x5b   : > { %1568 = vmatpush1.bf16.msra.mxu0 %v3134_v17  ;;  %v206_v17 = vld [vmem:[%s3486_s9] sm:$0xff] }
  0x5c   : > { %1569 = vmatprep.subr.bf16.mxu0 %v3142_v25  ;;  %v250_v25 = vld [vmem:[%s3486_s9 + $0x160] sm:$0xff]  ;;  %v430_v35 = vpack.c.bf16 %v213_v19, %v206_v17  ;;  %v285_v19 = vld [vmem:[%s3486_s9 + $0x278] sm:$0xff] }
  0x5d   : > { %v278_v17 = vld [vmem:[%s3486_s9 + $0x240] sm:$0xff] }
  0x5e   : > { %1415 = vmatmul.mubr.bf16.gmra.mrb[4].mxu0 %v439_v33  ;;  %v272_v33 = vld [vmem:[%s3486_s9 + $0x210] sm:$0xff]  ;;  %1212 = vmatmul.mubr.bf16.vlgmr.msra.gmra.mrb[0].mxu1 %v430_v35  ;;  %v270_v35 = vld [vmem:[%s3486_s9 + $0x200] sm:$0xff] }
  0x5f   : > { %1570 = vmatpush1.bf16.msra.mxu0 %v3140_v37  ;;  %1424 = vmatprep.mubr.bf16.mxu0 %v447_v38  ;;  %v438_v37 = vpack.c.bf16 %v228_v21, %v221_v20  ;;  %v453_v38 = vpack.c.bf16 %v257_v28, %v250_v25  ;;  %v461_v42 = vpack.c.bf16 %v272_v33, %v265_v31  ;;  %v3190_v20 = vld [vmem:[%s4517_s1 + $0x2a4] ss:$8 sps:$4 sm:$0xff]   ;;  %v300_v21 = vld [vmem:[%s3486_s9 + $0x2f0] sm:$0xff]  ;;  %v3188_v28 = vld [vmem:[%s4517_s1 + $0x2a0] ss:$8 sps:$4 sm:$0xff]  }
  0x60   : > { %1571 = vmatprep.subr.bf16.mxu0 %v3148_v41  ;;  %v3164_v41 = vld [vmem:[%s4517_s1 + $0x260] ss:$8 sps:$4 sm:$0xff]   ;;  %2827 = vmatpush1.bf16.msra.mxu1 %v3416_v1  ;;  %v467_v25 = vpack.c.bf16 %v285_v19, %v278_v17  ;;  %v3196_v31 = vld [vmem:[%s4517_s1 + $0x2b4] ss:$8 sps:$4 sm:$0xff]   ;;  %v3223_v19 = vld [vmem:[%s4517_s1 + $0x304] ss:$8 sps:$4 sm:$0xff]  }
  0x61   : > { %1221 = vmatprep.mubr.bf16.mxu1 %v438_v37  ;;  %2812 = vmatprep.subr.bf16.mxu1 %v3422_v2  ;;  %v279_v1 = vld [vmem:[%s3486_s9 + $0x248] sm:$0xff]  ;;  %v445_v2 = vpack.c.bf16 %v242_v50, %v235_v0  ;;  %v3194_v37 = vld [vmem:[%s4517_s1 + $0x2b0] ss:$8 sps:$4 sm:$0xff]  }
  0x62   : > { %v468_v62 = vpack.c.bf16 %v286_v58, %v279_v1  ;;  %v255_v33 = vld [vmem:[%s3486_s9 + $0x188] sm:$0xff]  ;;  %v306_v1 = vld [vmem:[%s3486_s9 + $0x320] sm:$0xff]  ;;  %v313_v58 = vld [vmem:[%s3486_s9 + $0x358] sm:$0xff] }
  0x63   : > { %1572 = vmatpush1.bf16.msra.mxu0 %v3146_v45  ;;  %v3172_v45 = vld [vmem:[%s4517_s1 + $0x274] ss:$8 sps:$4 sm:$0xff]   ;;  %v3200_v0 = vld [vmem:[%s4517_s1 + $0x2c0] ss:$8 sps:$4 sm:$0xff]  }
  0x64   : > { %1573 = vmatprep.subr.bf16.mxu0 %v3154_v56  ;;  %v271_v56 = vld [vmem:[%s3486_s9 + $0x208] sm:$0xff]  ;;  %2828 = vmatpush1.bf16.msra.mxu1 %v3428_v3  ;;  %v234_v3 = vld [vmem:[%s3486_s9 + $0xe0] sm:$0xff] }
  0x65   : > { %v460_v60 = vpack.c.bf16 %v271_v56, %v264_v55  ;;  %2813 = vmatprep.subr.bf16.mxu1 %v3434_v4  ;;  %v249_v4 = vld [vmem:[%s3486_s9 + $0x158] sm:$0xff]  ;;  %v284_v56 = vld [vmem:[%s3486_s9 + $0x270] sm:$0xff]  ;;  %v291_v17 = vld [vmem:[%s3486_s9 + $0x2a8] sm:$0xff] }
  0x66   : > { %1425 = vmatmul.mubr.bf16.gmra.mrb[8].mxu0 %v446_v61  ;;  %v3176_v61 = vld [vmem:[%s4517_s1 + $0x280] ss:$8 sps:$4 sm:$0xff]   ;;  %1222 = vmatmul.mubr.bf16.gmra.mrb[4].mxu1 %v437_v59  ;;  %v269_v55 = vld [vmem:[%s3486_s9 + $0x1f8] sm:$0xff] }
  0x67   : > { %1574 = vmatpush1.bf16.msra.mxu0 %v3152_v63  ;;  %1434 = vmatprep.mubr.bf16.mxu0 %v454_v13  ;;  %v3184_v63 = vld [vmem:[%s4517_s1 + $0x294] ss:$8 sps:$4 sm:$0xff]   ;;  %v211_v59 = vld [vmem:[%s3486_s9 + $0x28] sm:$0xff] }
  0x68   : > { %1575 = vmatprep.subr.bf16.mxu0 %v3160_v14  ;;  %1231 = vmatprep.mubr.bf16.mxu1 %v445_v2  ;;  %v241_v13 = vld [vmem:[%s3486_s9 + $0x118] sm:$0xff]  ;;  %v256_v14 = vld [vmem:[%s3486_s9 + $0x190] sm:$0xff]  ;;  %v218_v2 = vld [vmem:[%s3486_s9 + $0x60] sm:$0xff] }
  0x69   : > { %2829 = vmatpush1.bf16.msra.mxu1 %v3443_v5  ;;  %v293_v5 = vld [vmem:[%s3486_s9 + $0x2b8] sm:$0xff] }
  0x6a   : > { %2814 = vmatprep.subr.bf16.mxu1 %v3450_v6  ;;  %v452_v6 = vpack.c.bf16 %v256_v14, %v249_v4  ;;  %v283_v4 = vld [vmem:[%s3486_s9 + $0x268] sm:$0xff]  ;;  %v210_v14 = vld [vmem:[%s3486_s9 + $0x20] sm:$0xff] }
  0x6b   : > { %1576 = vmatpush1.bf16.msra.mxu0 %v3158_v24  ;;  %v444_v24 = vpack.c.bf16 %v241_v13, %v234_v3  ;;  %v435_v3 = vpack.c.bf16 %v218_v2, %v211_v59  ;;  %v276_v13 = vld [vmem:[%s3486_s9 + $0x230] sm:$0xff]  ;;  %v266_v59 = vld [vmem:[%s3486_s9 + $0x1e0] sm:$0xff]  ;;  %v273_v2 = vld [vmem:[%s3486_s9 + $0x218] sm:$0xff] }
  0x6c   : > { %1577 = vmatprep.subr.bf16.mxu0 %v3166_v29  ;;  %v475_v29 = vpack.c.bf16 %v300_v21, %v293_v5  ;;  %v232_v5 = vld [vmem:[%s3486_s9 + $0xd0] sm:$0xff]  ;;  %v465_v21 = vpack.c.bf16 %v283_v4, %v276_v13  ;;  %v353_v13 = vld [vmem:[%s3486_s9 + $0x498] sm:$0xff] }
  0x6d   : > { %2830 = vmatpush1.bf16.msra.mxu1 %v3456_v7  ;;  %v248_v7 = vld [vmem:[%s3486_s9 + $0x150] sm:$0xff]  ;;  %v361_v4 = vld [vmem:[%s3486_s9 + $0x4d8] sm:$0xff] }
  0x6e   : > { %1435 = vmatmul.mubr.bf16.gmra.mrb[12].mxu0 %v453_v38  ;;  %2815 = vmatprep.subr.bf16.mxu1 %v3463_v8  ;;  %v263_v8 = vld [vmem:[%s3486_s9 + $0x1c8] sm:$0xff]  ;;  %v292_v38 = vld [vmem:[%s3486_s9 + $0x2b0] sm:$0xff]  ;;  %v451_v46 = vpack.c.bf16 %v255_v33, %v248_v7  ;;  %v246_v33 = vld [vmem:[%s3486_s9 + $0x140] sm:$0xff] }
  0x6f   : > { %1578 = vmatpush1.bf16.msra.mxu0 %v3164_v41  ;;  %1444 = vmatprep.mubr.bf16.mxu0 %v461_v42  ;;  %v299_v41 = vld [vmem:[%s3486_s9 + $0x2e8] sm:$0xff] }
  0x70   : > { %1579 = vmatprep.subr.bf16.mxu0 %v3172_v45  ;;  %1232 = vmatmul.mubr.bf16.gmra.mrb[8].mxu1 %v444_v24  ;;  %v3202_v42 = vld [vmem:[%s4517_s1 + $0x2c4] ss:$8 sps:$4 sm:$0xff]   ;;  %v474_v49 = vpack.c.bf16 %v299_v41, %v292_v38 }
  0x71   : > { %1241 = vmatprep.mubr.bf16.mxu1 %v452_v6  ;;  %2831 = vmatpush1.bf16.msra.mxu1 %v3469_v9  ;;  %v307_v9 = vld [vmem:[%s3486_s9 + $0x328] sm:$0xff]  ;;  %v314_v45 = vld [vmem:[%s3486_s9 + $0x360] sm:$0xff] }
  0x72   : > { %2816 = vmatprep.subr.bf16.mxu1 %v3475_v10  ;;  %v459_v10 = vpack.c.bf16 %v270_v35, %v263_v8  ;;  %v482_v50 = vpack.c.bf16 %v314_v45, %v307_v9  ;;  %v239_v7 = vld [vmem:[%s3486_s9 + $0x108] sm:$0xff]  ;;  %v245_v9 = vld [vmem:[%s3486_s9 + $0x138] sm:$0xff]  ;;  %v260_v45 = vld [vmem:[%s3486_s9 + $0x1b0] sm:$0xff] }
  0x73   : > { %1580 = vmatpush1.bf16.msra.mxu0 %v3170_v54  ;;  %v3208_v54 = vld [vmem:[%s4517_s1 + $0x2d4] ss:$8 sps:$4 sm:$0xff]   ;;  %v311_v38 = vld [vmem:[%s3486_s9 + $0x348] sm:$0xff] }
  0x74   : > { %1581 = vmatprep.subr.bf16.mxu0 %v3178_v57  ;;  %v3206_v57 = vld [vmem:[%s4517_s1 + $0x2d0] ss:$8 sps:$4 sm:$0xff]   ;;  %v319_v41 = vld [vmem:[%s3486_s9 + $0x388] sm:$0xff] }
  0x75   : > { %2832 = vmatpush1.bf16.msra.mxu1 %v3481_v11  ;;  %v262_v11 = vld [vmem:[%s3486_s9 + $0x1c0] sm:$0xff] }
  0x76   : > { %1445 = vmatmul.mubr.bf16.gmra.mrb[16].mxu0 %v460_v60  ;;  %2817 = vmatprep.subr.bf16.mxu1 %v3492_v12  ;;  %v277_v12 = vld [vmem:[%s3486_s9 + $0x238] sm:$0xff]  ;;  %v458_v60 = vpack.c.bf16 %v269_v55, %v262_v11  ;;  %v259_v11 = vld [vmem:[%s3486_s9 + $0x1a8] sm:$0xff]  ;;  %v274_v55 = vld [vmem:[%s3486_s9 + $0x220] sm:$0xff] }
  0x77   : > { %1582 = vmatpush1.bf16.msra.mxu0 %v3176_v61  ;;  %1454 = vmatprep.mubr.bf16.mxu0 %v468_v62  ;;  %v481_v61 = vpack.c.bf16 %v313_v58, %v306_v1  ;;  %v3212_v62 = vld [vmem:[%s4517_s1 + $0x2e0] ss:$8 sps:$4 sm:$0xff]  }
  0x78   : > { %1583 = vmatprep.subr.bf16.mxu0 %v3184_v63  ;;  %1242 = vmatmul.mubr.bf16.gmra.mrb[12].mxu1 %v451_v46  ;;  %v3220_v63 = vld [vmem:[%s4517_s1 + $0x2f4] ss:$8 sps:$4 sm:$0xff]   ;;  %v339_v1 = vld [vmem:[%s3486_s9 + $0x428] sm:$0xff] }
  0x79   : > { %1251 = vmatprep.mubr.bf16.mxu1 %v459_v10  ;;  %2833 = vmatpush1.bf16.msra.mxu1 %v3505_v16  ;;  %v3214_v16 = vld [vmem:[%s4517_s1 + $0x2e4] ss:$8 sps:$4 sm:$0xff]  }
  0x7a   : > { %2818 = vmatprep.subr.bf16.mxu1 %v3512_v18  ;;  %v466_v18 = vpack.c.bf16 %v284_v56, %v277_v12  ;;  %v347_v58 = vld [vmem:[%s3486_s9 + $0x468] sm:$0xff] }
  0x7b   : > { %1584 = vmatpush1.bf16.msra.mxu0 %v3182_v15  ;;  %v217_v15 = vld [vmem:[%s3486_s9 + $0x58] sm:$0xff] }
  0x7c   : > { %1585 = vmatprep.subr.bf16.mxu0 %v3190_v20  ;;  %v225_v20 = vld [vmem:[%s3486_s9 + $0x98] sm:$0xff] }
  0x7d   : > { %2834 = vmatpush1.bf16.msra.mxu1 %v3524_v22  ;;  %v3218_v22 = vld [vmem:[%s4517_s1 + $0x2f0] ss:$8 sps:$4 sm:$0xff]   ;;  %v442_v6 = vpack.c.bf16 %v232_v5, %v225_v20 }
  0x7e   : > { %1455 = vmatmul.mubr.bf16.gmra.mrb[20].mxu0 %v467_v25  ;;  %2819 = vmatprep.subr.bf16.mxu1 %v3529_v23  ;;  %v298_v23 = vld [vmem:[%s3486_s9 + $0x2e0] sm:$0xff] }
  0x7f   : > { %1586 = vmatpush1.bf16.msra.mxu0 %v3188_v28  ;;  %1464 = vmatprep.mubr.bf16.mxu0 %v475_v29  ;;  %v473_v24 = vpack.c.bf16 %v298_v23, %v291_v17  ;;  %v290_v25 = vld [vmem:[%s3486_s9 + $0x2a0] sm:$0xff]  ;;  %v297_v28 = vld [vmem:[%s3486_s9 + $0x2d8] sm:$0xff]  ;;  %v224_v29 = vld [vmem:[%s3486_s9 + $0x90] sm:$0xff] }
  0x80   : > { %1587 = vmatprep.subr.bf16.mxu0 %v3196_v31  ;;  %1252 = vmatmul.mubr.bf16.gmra.mrb[16].mxu1 %v458_v60  ;;  %v305_v31 = vld [vmem:[%s3486_s9 + $0x318] sm:$0xff]  ;;  %v472_v8 = vpack.c.bf16 %v297_v28, %v290_v25  ;;  %v295_v17 = vld [vmem:[%s3486_s9 + $0x2c8] sm:$0xff]  ;;  %v302_v23 = vld [vmem:[%s3486_s9 + $0x300] sm:$0xff] }
  0x81   : > { %1261 = vmatprep.mubr.bf16.mxu1 %v466_v18  ;;  %2835 = vmatpush1.bf16.msra.mxu1 %v3542_v26  ;;  %v3221_v26 = vld [vmem:[%s4517_s1 + $0x300] ss:$8 sps:$4 sm:$0xff]   ;;  %v281_v60 = vld [vmem:[%s3486_s9 + $0x258] sm:$0xff] }
  0x82   : > { %2820 = vmatprep.subr.bf16.mxu1 %v3547_v27  ;;  %v434_v27 = vpack.c.bf16 %v217_v15, %v210_v14  ;;  %v280_v14 = vld [vmem:[%s3486_s9 + $0x250] sm:$0xff]  ;;  %v287_v15 = vld [vmem:[%s3486_s9 + $0x288] sm:$0xff]  ;;  %v294_v25 = vld [vmem:[%s3486_s9 + $0x2c0] sm:$0xff] }
  0x83   : > { %1588 = vmatpush1.bf16.msra.mxu0 %v3194_v37  ;;  %v449_v37 = vpack.c.bf16 %v246_v33, %v239_v7  ;;  %v469_v5 = vpack.c.bf16 %v287_v15, %v280_v14  ;;  %v301_v28 = vld [vmem:[%s3486_s9 + $0x2f8] sm:$0xff] }
  0x84   : > { %1589 = vmatprep.subr.bf16.mxu0 %v3202_v42  ;;  %v326_v42 = vld [vmem:[%s3486_s9 + $0x3c0] sm:$0xff]  ;;  %v476_v7 = vpack.c.bf16 %v301_v28, %v294_v25 }
  0x85   : > { %2836 = vmatpush1.bf16.msra.mxu1 %v3560_v30  ;;  %v312_v30 = vld [vmem:[%s3486_s9 + $0x350] sm:$0xff]  ;;  %v487_v10 = vpack.c.bf16 %v326_v42, %v319_v41  ;;  %v323_v41 = vld [vmem:[%s3486_s9 + $0x3a8] sm:$0xff]  ;;  %v330_v42 = vld [vmem:[%s3486_s9 + $0x3e0] sm:$0xff] }
  0x86   : > { %1465 = vmatmul.mubr.bf16.gmra.mrb[24].mxu0 %v474_v49  ;;  %2821 = vmatprep.subr.bf16.mxu1 %v3569_v32  ;;  %v231_v32 = vld [vmem:[%s3486_s9 + $0xc8] sm:$0xff]  ;;  %v480_v35 = vpack.c.bf16 %v312_v30, %v305_v31  ;;  %v316_v31 = vld [vmem:[%s3486_s9 + $0x370] sm:$0xff] }
  0x87   : > { %1590 = vmatpush1.bf16.msra.mxu0 %v3200_v0  ;;  %1474 = vmatprep.mubr.bf16.mxu0 %v482_v50  ;;  %v325_v0 = vld [vmem:[%s3486_s9 + $0x3b8] sm:$0xff] }
  0x88   : > { %1591 = vmatprep.subr.bf16.mxu0 %v3208_v54  ;;  %1262 = vmatmul.mubr.bf16.gmra.mrb[20].mxu1 %v465_v21  ;;  %v333_v50 = vld [vmem:[%s3486_s9 + $0x3f8] sm:$0xff]  ;;  %v340_v54 = vld [vmem:[%s3486_s9 + $0x430] sm:$0xff]  ;;  %v477_v21 = vpack.c.bf16 %v302_v23, %v295_v17 }
  0x89   : > { %1271 = vmatprep.mubr.bf16.mxu1 %v473_v24  ;;  %2837 = vmatpush1.bf16.msra.mxu1 %v3578_v34  ;;  %v441_v34 = vpack.c.bf16 %v231_v32, %v224_v29  ;;  %v367_v24 = vld [vmem:[%s3486_s9 + $0x508] sm:$0xff]  ;;  %v309_v29 = vld [vmem:[%s3486_s9 + $0x338] sm:$0xff] }
  0x8a   : > { %2822 = vmatprep.subr.bf16.mxu1 %v3587_v36  ;;  %v304_v36 = vld [vmem:[%s3486_s9 + $0x310] sm:$0xff]  ;;  %v484_v33 = vpack.c.bf16 %v316_v31, %v309_v29 }
  0x8b   : > { %1592 = vmatpush1.bf16.msra.mxu0 %v3206_v57  ;;  %v479_v46 = vpack.c.bf16 %v311_v38, %v304_v36  ;;  %v308_v36 = vld [vmem:[%s3486_s9 + $0x330] sm:$0xff]  ;;  %v315_v38 = vld [vmem:[%s3486_s9 + $0x368] sm:$0xff] }
  0x8c   : > { %1593 = vmatprep.subr.bf16.mxu0 %v3214_v16  ;;  %v354_v16 = vld [vmem:[%s3486_s9 + $0x4a0] sm:$0xff] }
  0x8d   : > { %2838 = vmatpush1.bf16.msra.mxu1 %v3599_v39  ;;  %v238_v39 = vld [vmem:[%s3486_s9 + $0x100] sm:$0xff] }
  0x8e   : > { %1475 = vmatmul.mubr.bf16.gmra.mrb[28].mxu0 %v481_v61  ;;  %2823 = vmatprep.subr.bf16.mxu1 %v3605_v40  ;;  %v253_v40 = vld [vmem:[%s3486_s9 + $0x178] sm:$0xff]  ;;  %v501_v61 = vpack.c.bf16 %v354_v16, %v347_v58  ;;  %v351_v58 = vld [vmem:[%s3486_s9 + $0x488] sm:$0xff]  ;;  %v358_v16 = vld [vmem:[%s3486_s9 + $0x4c0] sm:$0xff] }
  0x8f   : > { %1594 = vmatpush1.bf16.msra.mxu0 %v3212_v62  ;;  %1597 = vmatprep.mubr.bf16.mxu0 %v435_v3  ;;  %v456_v49 = vpack.c.bf16 %v260_v45, %v253_v40  ;;  %v462_v62 = vpack.c.bf16 %v273_v2, %v266_v59  ;;  %v346_v3 = vld [vmem:[%s3486_s9 + $0x460] sm:$0xff]  ;;  %v483_v40 = vpack.c.bf16 %v315_v38, %v308_v36 }
  0x90   : > { %1595 = vmatprep.subr.bf16.mxu0 %v3220_v63  ;;  %1272 = vmatmul.mubr.bf16.gmra.mrb[24].mxu1 %v472_v8  ;;  %v374_v8 = vld [vmem:[%s3486_s9 + $0x540] sm:$0xff]  ;;  %v491_v45 = vpack.c.bf16 %v330_v42, %v323_v41 }
  0x91   : > { %1281 = vmatprep.mubr.bf16.mxu1 %v480_v35  ;;  %2839 = vmatpush1.bf16.msra.mxu1 %v3617_v43  ;;  %v448_v43 = vpack.c.bf16 %v245_v9, %v238_v39  ;;  %v381_v35 = vld [vmem:[%s3486_s9 + $0x578] sm:$0xff] }
  0x92   : > { %2824 = vmatprep.subr.bf16.mxu1 %v3623_v44  ;;  %v318_v44 = vld [vmem:[%s3486_s9 + $0x380] sm:$0xff]  ;;  %v514_v39 = vpack.c.bf16 %v381_v35, %v374_v8  ;;  %v385_v35 = vld [vmem:[%s3486_s9 + $0x598] sm:$0xff] }
  0x93   : > { %1596 = vmatpush1.bf16.msra.mxu0 %v3218_v22  ;;  %v486_v12 = vpack.c.bf16 %v325_v0, %v318_v44  ;;  %v368_v22 = vld [vmem:[%s3486_s9 + $0x510] sm:$0xff]  ;;  %v322_v44 = vld [vmem:[%s3486_s9 + $0x3a0] sm:$0xff]  ;;  %v329_v0 = vld [vmem:[%s3486_s9 + $0x3d8] sm:$0xff] }
  0x94   : > { %1758 = vmatprep.subr.bf16.mxu0 %v3223_v19  ;;  %v500_v19 = vpack.c.bf16 %v353_v13, %v346_v3  ;;  %v508_v20 = vpack.c.bf16 %v368_v22, %v361_v4  ;;  %v350_v3 = vld [vmem:[%s3486_s9 + $0x480] sm:$0xff]  ;;  %v357_v13 = vld [vmem:[%s3486_s9 + $0x4b8] sm:$0xff]  ;;  %v372_v22 = vld [vmem:[%s3486_s9 + $0x530] sm:$0xff] }
  0x95   : > { %2840 = vmatpush1.bf16.msra.mxu1 %v3635_v47  ;;  %v252_v47 = vld [vmem:[%s3486_s9 + $0x170] sm:$0xff]  ;;  %v365_v4 = vld [vmem:[%s3486_s9 + $0x4f8] sm:$0xff]  ;;  %v504_v17 = vpack.c.bf16 %v357_v13, %v350_v3  ;;  %v378_v8 = vld [vmem:[%s3486_s9 + $0x560] sm:$0xff] }
  0x96   : > { %1598 = vmatmul.mubr.bf16.vlgmr.msra.gmra.mrb[0].mxu0 %v434_v27  ;;  %2825 = vmatprep.subr.bf16.mxu1 %v3641_v48  ;;  %v267_v48 = vld [vmem:[%s3486_s9 + $0x1e8] sm:$0xff]  ;;  %v455_v56 = vpack.c.bf16 %v259_v11, %v252_v47  ;;  %v512_v23 = vpack.c.bf16 %v372_v22, %v365_v4  ;;  %v518_v41 = vpack.c.bf16 %v385_v35, %v378_v8  ;;  %v390_v13 = vld [vmem:[%s3486_s9 + $0x5c0] sm:$0xff]  ;;  %v397_v4 = vld [vmem:[%s3486_s9 + $0x5f8] sm:$0xff] }
  0x97   : > { %1759 = vmatpush1.bf16.msra.mxu0 %v3221_v26  ;;  %1607 = vmatprep.mubr.bf16.mxu0 %v442_v6  ;;  %v463_v57 = vpack.c.bf16 %v274_v55, %v267_v48  ;;  %v360_v26 = vld [vmem:[%s3486_s9 + $0x4d0] sm:$0xff]  ;;  %v375_v27 = vld [vmem:[%s3486_s9 + $0x548] sm:$0xff]  ;;  %v382_v6 = vld [vmem:[%s3486_s9 + $0x580] sm:$0xff]  ;;  %v490_v48 = vpack.c.bf16 %v329_v0, %v322_v44 }
  0x98   : > { %1282 = vmatmul.mubr.bf16.gmra.mrb[28].mxu1 %v479_v46  ;;  %v507_v30 = vpack.c.bf16 %v367_v24, %v360_v26  ;;  %v515_v32 = vpack.c.bf16 %v382_v6, %v375_v27  ;;  %v388_v46 = vld [vmem:[%s3486_s9 + $0x5b0] sm:$0xff]  ;;  %v371_v24 = vld [vmem:[%s3486_s9 + $0x528] sm:$0xff]  ;;  %v386_v6 = vld [vmem:[%s3486_s9 + $0x5a0] sm:$0xff] }
  0x99   : > { %1291 = vmatprep.mubr.bf16.mxu1 %v487_v10  ;;  %2841 = vmatpush1.bf16.msra.mxu1 %v3653_v51  ;;  %v494_v51 = vpack.c.bf16 %v340_v54, %v333_v50  ;;  %v395_v10 = vld [vmem:[%s3486_s9 + $0x5e8] sm:$0xff]  ;;  %v337_v50 = vld [vmem:[%s3486_s9 + $0x418] sm:$0xff]  ;;  %v344_v54 = vld [vmem:[%s3486_s9 + $0x450] sm:$0xff] }
  0x9a   : > { %2826 = vmatprep.subr.bf16.mxu1 %v3659_v52  ;;  %v332_v52 = vld [vmem:[%s3486_s9 + $0x3f0] sm:$0xff]  ;;  %v521_v47 = vpack.c.bf16 %v395_v10, %v388_v46  ;;  %v498_v55 = vpack.c.bf16 %v344_v54, %v337_v50  ;;  %v379_v27 = vld [vmem:[%s3486_s9 + $0x568] sm:$0xff]  ;;  %v405_v22 = vld [vmem:[%s3486_s9 + $0x638] sm:$0xff] }
  0x9b   : > { %v493_v18 = vpack.c.bf16 %v339_v1, %v332_v52  ;;  %v336_v52 = vld [vmem:[%s3486_s9 + $0x410] sm:$0xff]  ;;  %v343_v1 = vld [vmem:[%s3486_s9 + $0x448] sm:$0xff]  ;;  %v519_v31 = vpack.c.bf16 %v386_v6, %v379_v27 }
  0x9c   : > { %v364_v26 = vld [vmem:[%s3486_s9 + $0x4f0] sm:$0xff]  ;;  %v399_v10 = vld [vmem:[%s3486_s9 + $0x608] sm:$0xff] }
  0x9d   : > { %2842 = vmatpush1.bf16.msra.mxu1 %v3664_v53  ;;  %v288_v53 = vld [vmem:[%s3486_s9 + $0x290] sm:$0xff]  ;;  %v511_v29 = vpack.c.bf16 %v371_v24, %v364_v26  ;;  %v3232_v6 = vld [vmem:[%s4518_s2 + $0x24] ss:$8 sps:$4 sm:$0xff]  }
  0x9e   : > { %1608 = vmatmul.mubr.bf16.gmra.mrb[4].mxu0 %v441_v34  ;;  %v470_v63 = vpack.c.bf16 %v288_v53, %v281_v60  ;;  %v389_v34 = vld [vmem:[%s3486_s9 + $0x5b8] sm:$0xff]  ;;  %v497_v60 = vpack.c.bf16 %v343_v1, %v336_v52  ;;  %v505_v53 = vpack.c.bf16 %v358_v16, %v351_v58  ;;  %v392_v46 = vld [vmem:[%s3486_s9 + $0x5d0] sm:$0xff] }
  0x9f   : > { %1617 = vmatprep.mubr.bf16.mxu0 %v449_v37  ;;  %v396_v37 = vld [vmem:[%s3486_s9 + $0x5f0] sm:$0xff]  ;;  %v525_v50 = vpack.c.bf16 %v399_v10, %v392_v46 }
  0xa0   : > { %1292 = vmatmul.mubr.bf16.gmra.mrb[32].mxu1 %v486_v12  ;;  %v522_v9 = vpack.c.bf16 %v396_v37, %v389_v34  ;;  %v402_v12 = vld [vmem:[%s3486_s9 + $0x620] sm:$0xff]  ;;  %v393_v34 = vld [vmem:[%s3486_s9 + $0x5d8] sm:$0xff]  ;;  %v400_v37 = vld [vmem:[%s3486_s9 + $0x610] sm:$0xff] }
  0xa1   : > { %1301 = vmatprep.mubr.bf16.mxu1 %v494_v51  ;;  %v409_v51 = vld [vmem:[%s3486_s9 + $0x658] sm:$0xff]  ;;  %v526_v42 = vpack.c.bf16 %v400_v37, %v393_v34 }
  0xa2   : > { %v528_v59 = vpack.c.bf16 %v409_v51, %v402_v12  ;;  %v406_v12 = vld [vmem:[%s3486_s9 + $0x640] sm:$0xff]  ;;  %v413_v51 = vld [vmem:[%s3486_s9 + $0x678] sm:$0xff] }
  0xa3   : > { %v532_v58 = vpack.c.bf16 %v413_v51, %v406_v12  ;;  %v3227_v24 = vld [vmem:[%s4518_s2 + $0x10] ss:$8 sps:$4 sm:$0xff]   ;;  %v275_v51 = vld [vmem:[%s3486_s9 + $0x228] sm:$0xff] }
  0xa4   : > { %v3233_v34 = vld [vmem:[%s4518_s2 + $0x30] ss:$8 sps:$4 sm:$0xff]  }
  0xa5   : > { %v3239_v46 = vld [vmem:[%s4518_s2 + $0x50] ss:$8 sps:$4 sm:$0xff]  }
  0xa6   : > { %1618 = vmatmul.mubr.bf16.gmra.mrb[8].mxu0 %v448_v43  ;;  %v403_v43 = vld [vmem:[%s3486_s9 + $0x628] sm:$0xff]  ;;  %v268_v12 = vld [vmem:[%s3486_s9 + $0x1f0] sm:$0xff] }
  0xa7   : > { %1627 = vmatprep.mubr.bf16.mxu0 %v456_v49  ;;  %v410_v49 = vld [vmem:[%s3486_s9 + $0x660] sm:$0xff] }
  0xa8   : > { %1302 = vmatmul.mubr.bf16.gmra.mrb[36].mxu1 %v493_v18  ;;  %v529_v11 = vpack.c.bf16 %v410_v49, %v403_v43  ;;  %v416_v18 = vld [vmem:[%s3486_s9 + $0x690] sm:$0xff]  ;;  %v407_v43 = vld [vmem:[%s3486_s9 + $0x648] sm:$0xff]  ;;  %v414_v49 = vld [vmem:[%s3486_s9 + $0x680] sm:$0xff] }
  0xa9   : > { %1311 = vmatprep.mubr.bf16.mxu1 %v501_v61  ;;  %v423_v61 = vld [vmem:[%s3486_s9 + $0x6c8] sm:$0xff]  ;;  %v533_v54 = vpack.c.bf16 %v414_v49, %v407_v43 }
  0xaa   : > { %v535_v14 = vpack.c.bf16 %v423_v61, %v416_v18  ;;  %v420_v18 = vld [vmem:[%s3486_s9 + $0x6b0] sm:$0xff]  ;;  %v427_v61 = vld [vmem:[%s3486_s9 + $0x6e8] sm:$0xff] }
  0xab   : > { %v539_v3 = vpack.c.bf16 %v427_v61, %v420_v18  ;;  %v3244_v43 = vld [vmem:[%s4518_s2 + $0x64] ss:$8 sps:$4 sm:$0xff]   ;;  %v3242_v49 = vld [vmem:[%s4518_s2 + $0x60] ss:$8 sps:$4 sm:$0xff]   ;;  %v296_v61 = vld [vmem:[%s3486_s9 + $0x2d0] sm:$0xff] }
  0xac   : > { %v3260_v18 = vld [vmem:[%s4518_s2 + $0xc0] ss:$8 sps:$4 sm:$0xff]  }
  0xae   : > { %1628 = vmatmul.mubr.bf16.gmra.mrb[12].mxu0 %v455_v56  ;;  %v417_v56 = vld [vmem:[%s3486_s9 + $0x698] sm:$0xff] }
  0xaf   : > { %1637 = vmatprep.mubr.bf16.mxu0 %v463_v57  ;;  %v424_v57 = vld [vmem:[%s3486_s9 + $0x6d0] sm:$0xff] }
  0xb0   : > { %1312 = vmatmul.mubr.bf16.gmra.mrb[40].mxu1 %v500_v19  ;;  %v536_v2 = vpack.c.bf16 %v424_v57, %v417_v56  ;;  %v320_v19 = vld [vmem:[%s3486_s9 + $0x390] sm:$0xff]  ;;  %v421_v56 = vld [vmem:[%s3486_s9 + $0x6b8] sm:$0xff] }
  0xb1   : > { %1321 = vmatprep.mubr.bf16.mxu1 %v508_v20  ;;  %v327_v20 = vld [vmem:[%s3486_s9 + $0x3c8] sm:$0xff]  ;;  %v428_v57 = vld [vmem:[%s3486_s9 + $0x6f0] sm:$0xff] }
  0xb2   : > { %v488_v25 = vpack.c.bf16 %v327_v20, %v320_v19  ;;  %v540_v16 = vpack.c.bf16 %v428_v57, %v421_v56  ;;  %v212_v19 = vld [vmem:[%s3486_s9 + $0x30] sm:$0xff]  ;;  %v219_v20 = vld [vmem:[%s3486_s9 + $0x68] sm:$0xff]  ;;  %v464_v57 = vpack.c.bf16 %v275_v51, %v268_v12 }
  0xb3   : > { %v436_v27 = vpack.c.bf16 %v219_v20, %v212_v19  ;;  %v3251_v56 = vld [vmem:[%s4518_s2 + $0x90] ss:$8 sps:$4 sm:$0xff]  }
  0xb4   : > { %v317_v19 = vld [vmem:[%s3486_s9 + $0x378] sm:$0xff] }
  0xb5   : > { %v3269_v12 = vld [vmem:[%s4518_s2 + $0xf0] ss:$8 sps:$4 sm:$0xff]  }
  0xb6   : > { %1638 = vmatmul.mubr.bf16.gmra.mrb[16].mxu0 %v462_v62  ;;  %v321_v62 = vld [vmem:[%s3486_s9 + $0x398] sm:$0xff] }
  0xb7   : > { %1647 = vmatprep.mubr.bf16.mxu0 %v470_v63  ;;  %v328_v63 = vld [vmem:[%s3486_s9 + $0x3d0] sm:$0xff] }
  0xb8   : > { %1322 = vmatmul.mubr.bf16.gmra.mrb[44].mxu1 %v507_v30  ;;  %v489_v15 = vpack.c.bf16 %v328_v63, %v321_v62  ;;  %v334_v30 = vld [vmem:[%s3486_s9 + $0x400] sm:$0xff] }
  0xb9   : > { %1331 = vmatprep.mubr.bf16.mxu1 %v515_v32  ;;  %v341_v32 = vld [vmem:[%s3486_s9 + $0x438] sm:$0xff] }
  0xba   : > { %v495_v36 = vpack.c.bf16 %v341_v32, %v334_v30  ;;  %v426_v30 = vld [vmem:[%s3486_s9 + $0x6e0] sm:$0xff]  ;;  %v3235_v32 = vld [vmem:[%s4518_s2 + $0x34] ss:$8 sps:$4 sm:$0xff]  }
  0xbe   : > { %1648 = vmatmul.mubr.bf16.gmra.mrb[20].mxu0 %v469_v5  ;;  %v335_v5 = vld [vmem:[%s3486_s9 + $0x408] sm:$0xff] }
  0xbf   : > { %1657 = vmatprep.mubr.bf16.mxu0 %v477_v21  ;;  %v342_v21 = vld [vmem:[%s3486_s9 + $0x440] sm:$0xff] }
  0xc0   : > { %1332 = vmatmul.mubr.bf16.gmra.mrb[48].mxu1 %v514_v39  ;;  %v496_v28 = vpack.c.bf16 %v342_v21, %v335_v5  ;;  %v348_v39 = vld [vmem:[%s3486_s9 + $0x470] sm:$0xff]  ;;  %v523_v21 = vpack.c.bf16 %v397_v4, %v390_v13 }
  0xc1   : > { %1341 = vmatprep.mubr.bf16.mxu1 %v522_v9  ;;  %v355_v9 = vld [vmem:[%s3486_s9 + $0x4a8] sm:$0xff]  ;;  %v3229_v5 = vld [vmem:[%s4518_s2 + $0x14] ss:$8 sps:$4 sm:$0xff]  }
  0xc2   : > { %v502_v44 = vpack.c.bf16 %v355_v9, %v348_v39  ;;  %v3241_v39 = vld [vmem:[%s4518_s2 + $0x54] ss:$8 sps:$4 sm:$0xff]  }
  0xc3   : > { %v240_v9 = vld [vmem:[%s3486_s9 + $0x110] sm:$0xff] }
  0xc4   : > { %v3265_v13 = vld [vmem:[%s4518_s2 + $0xd4] ss:$8 sps:$4 sm:$0xff]  }
  0xc6   : > { %1658 = vmatmul.mubr.bf16.gmra.mrb[24].mxu0 %v476_v7  ;;  %v349_v7 = vld [vmem:[%s3486_s9 + $0x478] sm:$0xff] }
  0xc7   : > { %1667 = vmatprep.mubr.bf16.mxu0 %v484_v33  ;;  %v356_v33 = vld [vmem:[%s3486_s9 + $0x4b0] sm:$0xff] }
  0xc8   : > { %1342 = vmatmul.mubr.bf16.gmra.mrb[52].mxu1 %v521_v47  ;;  %v503_v38 = vpack.c.bf16 %v356_v33, %v349_v7  ;;  %v362_v47 = vld [vmem:[%s3486_s9 + $0x4e0] sm:$0xff]  ;;  %v233_v33 = vld [vmem:[%s3486_s9 + $0xd8] sm:$0xff] }
  0xc9   : > { %1351 = vmatprep.mubr.bf16.mxu1 %v529_v11  ;;  %v369_v11 = vld [vmem:[%s3486_s9 + $0x518] sm:$0xff]  ;;  %v226_v7 = vld [vmem:[%s3486_s9 + $0xa0] sm:$0xff] }
  0xca   : > { %v509_v52 = vpack.c.bf16 %v369_v11, %v362_v47  ;;  %v443_v37 = vpack.c.bf16 %v233_v33, %v226_v7  ;;  %v3250_v11 = vld [vmem:[%s4518_s2 + $0x84] ss:$8 sps:$4 sm:$0xff]   ;;  %v345_v7 = vld [vmem:[%s3486_s9 + $0x458] sm:$0xff] }
  0xce   : > { %1668 = vmatmul.mubr.bf16.gmra.mrb[28].mxu0 %v483_v40  ;;  %v363_v40 = vld [vmem:[%s3486_s9 + $0x4e8] sm:$0xff] }
  0xcf   : > { %1677 = vmatprep.mubr.bf16.mxu0 %v491_v45  ;;  %v370_v45 = vld [vmem:[%s3486_s9 + $0x520] sm:$0xff] }
  0xd0   : > { %1352 = vmatmul.mubr.bf16.gmra.mrb[56].mxu1 %v528_v59  ;;  %v510_v0 = vpack.c.bf16 %v370_v45, %v363_v40  ;;  %v376_v59 = vld [vmem:[%s3486_s9 + $0x550] sm:$0xff]  ;;  %v247_v40 = vld [vmem:[%s3486_s9 + $0x148] sm:$0xff] }
  0xd1   : > { %1361 = vmatprep.mubr.bf16.mxu1 %v536_v2  ;;  %v383_v2 = vld [vmem:[%s3486_s9 + $0x588] sm:$0xff]  ;;  %v450_v10 = vpack.c.bf16 %v247_v40, %v240_v9 }
  0xd2   : > { %v516_v62 = vpack.c.bf16 %v383_v2, %v376_v59  ;;  %v289_v59 = vld [vmem:[%s3486_s9 + $0x298] sm:$0xff] }
  0xd3   : > { %v3257_v2 = vld [vmem:[%s4518_s2 + $0xb0] ss:$8 sps:$4 sm:$0xff]  }
  0xd6   : > { %1678 = vmatmul.mubr.bf16.gmra.mrb[32].mxu0 %v490_v48  ;;  %v377_v48 = vld [vmem:[%s3486_s9 + $0x558] sm:$0xff] }
  0xd7   : > { %1687 = vmatprep.mubr.bf16.mxu0 %v498_v55  ;;  %v384_v55 = vld [vmem:[%s3486_s9 + $0x590] sm:$0xff] }
  0xd8   : > { %1362 = vmatmul.mubr.bf16.gmra.mrb[60].mxu1 %v535_v14  ;;  %v517_v1 = vpack.c.bf16 %v384_v55, %v377_v48  ;;  %v412_v14 = vld [vmem:[%s3486_s9 + $0x670] sm:$0xff]  ;;  %v3248_v48 = vld [vmem:[%s4518_s2 + $0x80] ss:$8 sps:$4 sm:$0xff]  }
  0xd9   : > { %1484 = vmatprep.mubr.bf16.mxu1 %v489_v15  ;;  %v3224_v15 = vld [vmem:[%s4518_s2] ss:$8 sps:$4 sm:$0xff]   ;;  %v531_v26 = vpack.c.bf16 %v412_v14, %v405_v22  ;;  %v3253_v55 = vld [vmem:[%s4518_s2 + $0x94] ss:$8 sps:$4 sm:$0xff]   ;;  %v3263_v22 = vld [vmem:[%s4518_s2 + $0xd0] ss:$8 sps:$4 sm:$0xff]  }
  0xde   : > { %1688 = vmatmul.mubr.bf16.gmra.mrb[36].mxu0 %v497_v60  ;;  %v391_v60 = vld [vmem:[%s3486_s9 + $0x5c8] sm:$0xff] }
  0xdf   : > { %1697 = vmatprep.mubr.bf16.mxu0 %v505_v53  ;;  %v398_v53 = vld [vmem:[%s3486_s9 + $0x600] sm:$0xff] }
  0xe0   : > { %1485 = vmatmul.mubr.bf16.vlgmr.msra.gmra.mrb[32].mxu1 %v488_v25  ;;  %v524_v63 = vpack.c.bf16 %v398_v53, %v391_v60  ;;  %v404_v25 = vld [vmem:[%s3486_s9 + $0x630] sm:$0xff]  ;;  %v3262_v53 = vld [vmem:[%s4518_s2 + $0xc4] ss:$8 sps:$4 sm:$0xff]  }
  0xe1   : > { %1494 = vmatprep.mubr.bf16.mxu1 %v496_v28  ;;  %v411_v28 = vld [vmem:[%s3486_s9 + $0x668] sm:$0xff] }
  0xe2   : > { %v530_v8 = vpack.c.bf16 %v411_v28, %v404_v25 }
  0xe6   : > { %1698 = vmatmul.mubr.bf16.gmra.mrb[40].mxu0 %v504_v17  ;;  %v3226_v17 = vld [vmem:[%s4518_s2 + $0x4] ss:$8 sps:$4 sm:$0xff]  }
  0xe7   : > { %1707 = vmatprep.mubr.bf16.mxu0 %v512_v23  ;;  %v3336_v23 = vmov 0   ;;  %2239 = vmatprep.subr.bf16.mxu1 %v3226_v17  ;;  %v310_v17 = vld [vmem:[%s3486_s9 + $0x340] sm:$0xff] }
  0xe8   : > { %1495 = vmatmul.mubr.bf16.gmra.mrb[36].mxu1 %v495_v36  ;;  %v3238_v36 = vld [vmem:[%s4518_s2 + $0x44] ss:$8 sps:$4 sm:$0xff]  }
  0xe9   : > { %1504 = vmatprep.mubr.bf16.mxu1 %v503_v38  ;;  %2240 = vmatpush1.bf16.msra.mxu1 %v3224_v15  ;;  %v418_v38 = vld [vmem:[%s3486_s9 + $0x6a0] sm:$0xff] }
  0xea   : > { %2241 = vmatprep.subr.bf16.mxu1 %v3229_v5 }
  0xed   : > { %2242 = vmatpush1.bf16.msra.mxu1 %v3227_v24 }
  0xee   : > { %1708 = vmatmul.mubr.bf16.gmra.mrb[44].mxu0 %v511_v29  ;;  %v3230_v29 = vld [vmem:[%s4518_s2 + $0x20] ss:$8 sps:$4 sm:$0xff]   ;;  %2243 = vmatprep.subr.bf16.mxu1 %v3232_v6 }
  0xef   : > { %1717 = vmatprep.mubr.bf16.mxu0 %v519_v31  ;;  %v419_v31 = vld [vmem:[%s3486_s9 + $0x6a8] sm:$0xff] }
  0xf0   : > { %1505 = vmatmul.mubr.bf16.gmra.mrb[40].mxu1 %v502_v44  ;;  %v538_v35 = vpack.c.bf16 %v426_v30, %v419_v31  ;;  %v3247_v44 = vld [vmem:[%s4518_s2 + $0x74] ss:$8 sps:$4 sm:$0xff]   ;;  %v331_v6 = vld [vmem:[%s3486_s9 + $0x3e8] sm:$0xff] }
  0xf1   : > { %1514 = vmatprep.mubr.bf16.mxu1 %v510_v0  ;;  %2244 = vmatpush1.bf16.msra.mxu1 %v3230_v29  ;;  %v254_v0 = vld [vmem:[%s3486_s9 + $0x180] sm:$0xff] }
  0xf2   : > { %2245 = vmatprep.subr.bf16.mxu1 %v3235_v32  ;;  %v338_v32 = vld [vmem:[%s3486_s9 + $0x420] sm:$0xff] }
  0xf5   : > { %2246 = vmatpush1.bf16.msra.mxu1 %v3233_v34  ;;  %v499_v34 = vpack.c.bf16 %v345_v7, %v338_v32 }
  0xf6   : > { %1718 = vmatmul.mubr.bf16.gmra.mrb[48].mxu0 %v518_v41  ;;  %v425_v41 = vld [vmem:[%s3486_s9 + $0x6d8] sm:$0xff]  ;;  %2247 = vmatprep.subr.bf16.mxu1 %v3238_v36  ;;  %v352_v36 = vld [vmem:[%s3486_s9 + $0x490] sm:$0xff] }
  0xf7   : > { %1727 = vmatprep.mubr.bf16.mxu0 %v526_v42  ;;  %v3236_v42 = vld [vmem:[%s4518_s2 + $0x40] ss:$8 sps:$4 sm:$0xff]   ;;  %v537_v45 = vpack.c.bf16 %v425_v41, %v418_v38 }
  0xf8   : > { %1515 = vmatmul.mubr.bf16.gmra.mrb[44].mxu1 %v509_v52  ;;  %v3256_v52 = vld [vmem:[%s4518_s2 + $0xa4] ss:$8 sps:$4 sm:$0xff]  }
  0xf9   : > { %1524 = vmatprep.mubr.bf16.mxu1 %v517_v1  ;;  %2248 = vmatpush1.bf16.msra.mxu1 %v3236_v42  ;;  %v3254_v1 = vld [vmem:[%s4518_s2 + $0xa0] ss:$8 sps:$4 sm:$0xff]  }
  0xfa   : > { %2249 = vmatprep.subr.bf16.mxu1 %v3241_v39  ;;  %v359_v38 = vld [vmem:[%s3486_s9 + $0x4c8] sm:$0xff] }
  0xfb   : > { %v506_v9 = vpack.c.bf16 %v359_v38, %v352_v36 }
  0xfd   : > { %2250 = vmatpush1.bf16.msra.mxu1 %v3239_v46  ;;  %v373_v46 = vld [vmem:[%s3486_s9 + $0x538] sm:$0xff] }
  0xfe   : > { %1728 = vmatmul.mubr.bf16.gmra.mrb[52].mxu0 %v525_v50  ;;  %2251 = vmatprep.subr.bf16.mxu1 %v3244_v43  ;;  %v261_v50 = vld [vmem:[%s3486_s9 + $0x1b8] sm:$0xff] }
  0xff   : > { %1737 = vmatprep.mubr.bf16.mxu0 %v533_v54  ;;  %v3245_v54 = vld [vmem:[%s4518_s2 + $0x70] ss:$8 sps:$4 sm:$0xff]   ;;  %v457_v47 = vpack.c.bf16 %v261_v50, %v254_v0  ;;  %v3268_v50 = vld [vmem:[%s4518_s2 + $0xe4] ss:$8 sps:$4 sm:$0xff]  }
 0x100   : > { %1525 = vmatmul.mubr.bf16.gmra.mrb[48].mxu1 %v516_v62  ;;  %v303_v62 = vld [vmem:[%s3486_s9 + $0x308] sm:$0xff] }
 0x101   : > { %1534 = vmatprep.mubr.bf16.mxu1 %v524_v63  ;;  %2252 = vmatpush1.bf16.msra.mxu1 %v3242_v49  ;;  %v478_v14 = vpack.c.bf16 %v303_v62, %v296_v61  ;;  %v415_v61 = vld [vmem:[%s3486_s9 + $0x688] sm:$0xff] }
 0x102   : > { %2253 = vmatprep.subr.bf16.mxu1 %v3247_v44 }
 0x105   : > { %2254 = vmatpush1.bf16.msra.mxu1 %v3245_v54  ;;  %v3266_v54 = vld [vmem:[%s4518_s2 + $0xe0] ss:$8 sps:$4 sm:$0xff]  }
 0x106   : > { %1738 = vmatmul.mubr.bf16.gmra.mrb[56].mxu0 %v532_v58  ;;  %2255 = vmatprep.subr.bf16.mxu1 %v3250_v11  ;;  %v3259_v58 = vld [vmem:[%s4518_s2 + $0xb4] ss:$8 sps:$4 sm:$0xff]  }
 0x107   : > { %1747 = vmatprep.mubr.bf16.mxu0 %v540_v16  ;;  %v282_v16 = vld [vmem:[%s3486_s9 + $0x260] sm:$0xff]  ;;  %v380_v11 = vld [vmem:[%s3486_s9 + $0x570] sm:$0xff] }
 0x108   : > { %1535 = vmatmul.mubr.bf16.gmra.mrb[52].mxu1 %v523_v21  ;;  %v471_v60 = vpack.c.bf16 %v289_v59, %v282_v16 }
 0x109   : > { %1544 = vmatprep.mubr.bf16.mxu1 %v531_v26  ;;  %2256 = vmatpush1.bf16.msra.mxu1 %v3248_v48  ;;  %v485_v26 = vpack.c.bf16 %v317_v19, %v310_v17  ;;  %v387_v48 = vld [vmem:[%s3486_s9 + $0x5a8] sm:$0xff] }
 0x10a   : > { %2257 = vmatprep.subr.bf16.mxu1 %v3253_v55 }
 0x10d   : > { %2258 = vmatpush1.bf16.msra.mxu1 %v3251_v56 }
 0x10e   : > { %1748 = vmatmul.mubr.bf16.gmra.mrb[60].mxu0 %v539_v3  ;;  %2259 = vmatprep.subr.bf16.mxu1 %v3256_v52 }
 0x10f   : > { %1790 = vmatprep.mubr.bf16.mxu0 %v3336_v23 }
 0x110   : > { %1545 = vmatmul.mubr.bf16.gmra.mrb[56].mxu1 %v530_v8 }
 0x111   : > { %1554 = vmatprep.mubr.bf16.mxu1 %v538_v35  ;;  %2260 = vmatpush1.bf16.msra.mxu1 %v3254_v1  ;;  %v394_v1 = vld [vmem:[%s3486_s9 + $0x5e0] sm:$0xff] }
 0x112   : > { %2261 = vmatprep.subr.bf16.mxu1 %v3259_v58  ;;  %v401_v58 = vld [vmem:[%s3486_s9 + $0x618] sm:$0xff] }
 0x115   : > { %2262 = vmatpush1.bf16.msra.mxu1 %v3257_v2 }
 0x116   : > { %2749 = vmatmul.mubr.msk.bf16.vlgmr.msra.gmra.mrb[0].mxu0 %vm1130_vm0, %v436_v27  ;;  %2263 = vmatprep.subr.bf16.mxu1 %v3262_v53  ;;  %v324_v27 = vld [vmem:[%s3486_s9 + $0x3b0] sm:$0xff] }
 0x117   : > { %1800 = vmatprep.mubr.bf16.mxu0 %v3336_v23  ;;  %v492_v31 = vpack.c.bf16 %v331_v6, %v324_v27 }
 0x118   : > { %1555 = vmatmul.mubr.bf16.gmra.mrb[60].mxu1 %v537_v45  ;;  %v366_v45 = vld [vmem:[%s3486_s9 + $0x500] sm:$0xff] }
 0x119   : > { %2264 = vmatpush1.bf16.msra.mxu1 %v3260_v18  ;;  %v513_v44 = vpack.c.bf16 %v373_v46, %v366_v45  ;;  %v408_v18 = vld [vmem:[%s3486_s9 + $0x650] sm:$0xff] }
 0x11a   : > { %2265 = vmatprep.subr.bf16.mxu1 %v3265_v13  ;;  %v534_v62 = vpack.c.bf16 %v415_v61, %v408_v18  ;;  %v422_v13 = vld [vmem:[%s3486_s9 + $0x6c0] sm:$0xff] }
 0x11d   : > { %2266 = vmatpush1.bf16.msra.mxu1 %v3263_v22  ;;  %v429_v22 = vld [vmem:[%s3486_s9 + $0x6f8] sm:$0xff]  ;;  %s179_s9 = sand.u32 1, %s3326_s13  }
 0x11e   : > { %2750 = vmatmul.mubr.msk.bf16.gmra.mrb[4].mxu0 %vm1130_vm0, %v443_v37  ;;  %2267 = vmatprep.subr.bf16.mxu1 %v3268_v50  ;;  %s2648_s4 = sshll.u32 %s179_s9, 9  ;;  %s4455_s6 = scalar_lea.sflag [#allocation3], %s179_s9 }
 0x11f   : > { %1810 = vmatprep.mubr.bf16.mxu0 %v3336_v23  ;;  %s4387_s5 = scalar_lea.vmem [#allocation2], %s2648_s4 }
 0x121   : > { %2268 = vmatpush1.bf16.msra.mxu1 %v3266_v54 }
 0x126   : > { %2751 = vmatmul.mubr.msk.bf16.gmra.mrb[8].mxu0 %vm1130_vm0, %v450_v10 }
 0x127   : > { %1820 = vmatprep.mubr.bf16.mxu0 %v3336_v23 }
 0x12e   : > { %2752 = vmatmul.mubr.msk.bf16.gmra.mrb[12].mxu0 %vm1130_vm0, %v457_v47  ;;  %v3271_v47 = vld [vmem:[%s4518_s2 + $0xf4] ss:$8 sps:$4 sm:$0xff]  }
 0x12f   : > { %1830 = vmatprep.mubr.bf16.mxu0 %v3336_v23  ;;  %2269 = vmatprep.subr.bf16.mxu1 %v3271_v47 }
 0x130   : > { %2270 = vmatpush1.bf16.msra.mxu1 %v3269_v12 }
 0x131   : > { %v4137_v63 = vpop.f32.mrb[0].mxu1 }
 0x132   : > { %v4139_v3 = vpop.f32.mrb[1].mxu1 }
 0x133   : > { %v4144_v4 = vpop.f32.mrb[2].mxu1 }
 0x134   : > { %v4149_v15 = vpop.f32.mrb[3].mxu1 }
 0x136   : > { %2753 = vmatmul.mubr.msk.bf16.gmra.mrb[16].mxu0 %vm1130_vm0, %v464_v57  ;;  %v520_v57 = vpack.c.bf16 %v387_v48, %v380_v11 }
 0x137   : > { %1840 = vmatprep.mubr.bf16.mxu0 %v3336_v23 }
 0x139   : > { %v4155_v20 = vpop.f32.mrb[4].mxu1 }
 0x13a   : > { %v4157_v5 = vpop.f32.mrb[5].mxu1 }
 0x13b   : > { %v4159_v21 = vpop.f32.mrb[6].mxu1 }
 0x13c   : > { %v4161_v24 = vpop.f32.mrb[7].mxu1 }
 0x13e   : > { %2754 = vmatmul.mubr.msk.bf16.gmra.mrb[20].mxu0 %vm1130_vm0, %v471_v60  ;;  %v527_v60 = vpack.c.bf16 %v401_v58, %v394_v1 }
 0x13f   : > { %1850 = vmatprep.mubr.bf16.mxu0 %v3336_v23 }
 0x143   : > { %v4167_v25 = vpop.f32.mrb[8].mxu1 }
 0x144   : > { %v4169_v28 = vpop.f32.mrb[9].mxu1 }
 0x145   : > { %v4171_v29 = vpop.f32.mrb[10].mxu1 }
 0x146   : > { %2755 = vmatmul.mubr.msk.bf16.gmra.mrb[24].mxu0 %vm1130_vm0, %v478_v14  ;;  %v4173_v30 = vpop.f32.mrb[11].mxu1  ;;  %v541_v14 = vpack.c.bf16 %v429_v22, %v422_v13 }
 0x147   : > { %1860 = vmatprep.mubr.bf16.mxu0 %v3336_v23 }
 0x14b   : > { %v4179_v33 = vpop.f32.mrb[12].mxu1 }
 0x14c   : > { %v4181_v8 = vpop.f32.mrb[13].mxu1 }
 0x14d   : > { %v4183_v35 = vpop.f32.mrb[14].mxu1 }
 0x14e   : > { %2756 = vmatmul.mubr.msk.bf16.gmra.mrb[28].mxu0 %vm1130_vm0, %v485_v26  ;;  %v4185_v37 = vpop.f32.mrb[15].mxu1 }
 0x14f   : > { %1870 = vmatprep.mubr.bf16.mxu0 %v3336_v23 }
 0x153   : > { %v4191_v41 = vpop.f32.mrb[16].mxu1 }
 0x154   : > { %v4193_v42 = vpop.f32.mrb[17].mxu1 }
 0x155   : > { %v4195_v39 = vpop.f32.mrb[18].mxu1 }
 0x156   : > { %2757 = vmatmul.mubr.msk.bf16.gmra.mrb[32].mxu0 %vm1130_vm0, %v492_v31  ;;  %v4197_v40 = vpop.f32.mrb[19].mxu1 }
 0x157   : > { %1880 = vmatprep.mubr.bf16.mxu0 %v3336_v23 }
 0x15b   : > { %v4203_v10 = vpop.f32.mrb[20].mxu1 }
 0x15c   : > { %v4205_v43 = vpop.f32.mrb[21].mxu1 }
 0x15d   : > { %v4207_v49 = vpop.f32.mrb[22].mxu1 }
 0x15e   : > { %2758 = vmatmul.mubr.msk.bf16.gmra.mrb[36].mxu0 %vm1130_vm0, %v499_v34  ;;  %v4209_v0 = vpop.f32.mrb[23].mxu1 }
 0x15f   : > { %1890 = vmatprep.mubr.bf16.mxu0 %v3336_v23 }
 0x163   : > { %v4224_v55 = vpop.f32.mrb[24].mxu1 }
 0x164   : > { %v4229_v51 = vpop.f32.mrb[25].mxu1 }
 0x165   : > { %v4231_v56 = vpop.f32.mrb[26].mxu1 }
 0x166   : > { %2759 = vmatmul.mubr.msk.bf16.gmra.mrb[40].mxu0 %vm1130_vm0, %v506_v9  ;;  %v4233_v52 = vpop.f32.mrb[27].mxu1 }
 0x167   : > { %1900 = vmatprep.mubr.bf16.mxu0 %v3336_v23 }
 0x16b   : > { %v4239_v16 = vpop.f32.mrb[28].mxu1 }
 0x16c   : > { %v4241_v59 = vpop.f32.mrb[29].mxu1 }
 0x16d   : > { %v4243_v2 = vpop.f32.mrb[30].mxu1 }
 0x16e   : > { %2760 = vmatmul.mubr.msk.bf16.gmra.mrb[44].mxu0 %vm1130_vm0, %v513_v44  ;;  %v4245_v53 = vpop.f32.mrb[31].mxu1 }
 0x16f   : > { %1910 = vmatprep.mubr.bf16.mxu0 %v3336_v23 }
 0x176   : > { %2761 = vmatmul.mubr.msk.bf16.gmra.mrb[48].mxu0 %vm1130_vm0, %v520_v57 }
 0x177   : > { %1920 = vmatprep.mubr.bf16.mxu0 %v3336_v23 }
 0x17e   : > { %2762 = vmatmul.mubr.msk.bf16.gmra.mrb[52].mxu0 %vm1130_vm0, %v527_v60 }
 0x17f   : > { %1930 = vmatprep.mubr.bf16.mxu0 %v3336_v23 }
 0x186   : > { %2763 = vmatmul.mubr.msk.bf16.gmra.mrb[56].mxu0 %vm1130_vm0, %v534_v62 }
 0x187   : > { %1940 = vmatprep.mubr.bf16.mxu0 %v3336_v23 }
 0x18e   : > { %2764 = vmatmul.mubr.msk.bf16.gmra.mrb[60].mxu0 %vm1130_vm0, %v541_v14 }
 0x1b3   : > { %v4256_v17 = vpop.f32.mrb[32].mxu1 }
 0x1b4   : > { %v4258_v19 = vpop.f32.mrb[33].mxu1 }
 0x1b5   : > { %v4260_v26 = vpop.f32.mrb[34].mxu1 }
 0x1b6   : > { %v4262_v27 = vpop.f32.mrb[35].mxu1 }
 0x1bb   : > { %v4264_v6 = vpop.f32.mrb[36].mxu1 }
 0x1bc   : > { %v4266_v31 = vpop.f32.mrb[37].mxu1 }
 0x1bd   : > { %v4268_v32 = vpop.f32.mrb[38].mxu1 }
 0x1be   : > { %v4270_v23 = vpop.f32.mrb[39].mxu1 }
 0x1c3   : > { %v4272_v7 = vpop.f32.mrb[40].mxu1 }
 0x1c4   : > { %v4274_v34 = vpop.f32.mrb[41].mxu1 }
 0x1c5   : > { %v4276_v36 = vpop.f32.mrb[42].mxu1 }
 0x1c6   : > { %v4278_v38 = vpop.f32.mrb[43].mxu1 }
 0x1cb   : > { %v4280_v9 = vpop.f32.mrb[44].mxu1 }
 0x1cc   : > { %v4282_v45 = vpop.f32.mrb[45].mxu1 }
 0x1cd   : > { %v4284_v46 = vpop.f32.mrb[46].mxu1 }
 0x1ce   : > { %v4286_v44 = vpop.f32.mrb[47].mxu1 }
 0x1d3   : > { %v4288_v50 = vpop.f32.mrb[48].mxu1 }
 0x1d4   : > { %4522 = vst [vmem:[#allocation5_spill] sm:$0xff] %v4288_v50  ;;  %v4290_v54 = vpop.f32.mrb[49].mxu1 }
 0x1d5   : > { %4523 = vst [vmem:[#allocation6_spill] sm:$0xff] %v4290_v54  ;;  %v4292_v47 = vpop.f32.mrb[50].mxu1 }
 0x1d6   : > { %4524 = vst [vmem:[#allocation7_spill] sm:$0xff] %v4292_v47  ;;  %v4294_v11 = vpop.f32.mrb[51].mxu1 }
 0x1d7   : > { %4525 = vst [vmem:[#allocation8_spill] sm:$0xff] %v4294_v11 }
 0x1db   : > { %v4296_v48 = vpop.f32.mrb[52].mxu1 }
 0x1dc   : > { %4526 = vst [vmem:[#allocation9_spill] sm:$0xff] %v4296_v48  ;;  %v4298_v12 = vpop.f32.mrb[53].mxu1 }
 0x1dd   : > { %4527 = vst [vmem:[#allocation10_spill] sm:$0xff] %v4298_v12  ;;  %v4300_v1 = vpop.f32.mrb[54].mxu1 }
 0x1de   : > { %4528 = vst [vmem:[#allocation11_spill] sm:$0xff] %v4300_v1  ;;  %v4303_v18 = vpop.f32.mrb[55].mxu1 }
 0x1df   : > { %4529 = vst [vmem:[#allocation12_spill] sm:$0xff] %v4303_v18 }
 0x1e3   : > { %v4308_v54 = vpop.f32.mrb[56].mxu1 }
 0x1e4   : > { %v4310_v50 = vpop.f32.mrb[57].mxu1 }
 0x1e5   : > { %v4312_v18 = vpop.f32.mrb[58].mxu1 }
 0x1e9   : > { %v1792_v57 = vpop.f32.mrb[0].mxu0 }
 0x1ea   : > { %v2843_v58 = vadd.f32 %v1792_v57, %v4137_v63  ;;  %v1794_v60 = vpop.f32.mrb[1].mxu0 }
 0x1eb   : > { %v2844_v61 = vadd.f32 %v1794_v60, %v4139_v3  ;;  %v1796_v62 = vpop.f32.mrb[2].mxu0 }
 0x1ec   : > { %v2845_v13 = vadd.f32 %v1796_v62, %v4144_v4  ;;  %v1798_v22 = vpop.f32.mrb[3].mxu0  ;;  %v1951_v11 = vmax.f32 %v2843_v58, 0.0  ;;  %v4315_v4 = vpop.f32.mrb[59].mxu1 }
 0x1ed   : > { %v2846_v14 = vadd.f32 %v1798_v22, %v4149_v15  ;;  %v1952_v47 = vmax.f32 %v2844_v61, 0.0  ;;  %4530 = vst [vmem:[#allocation13_spill] sm:$0xff] %v4315_v4  ;;  %v4320_v22 = vpop.f32.mrb[60].mxu1 }
 0x1ee   : > { %v1953_v48 = vmax.f32 %v2845_v13, 0.0 }
 0x1ef   : > { %v1954_v12 = vmax.f32 %v2846_v14, 0.0  ;;  %v4322_v14 = vpop.f32.mrb[61].mxu1 }
 0x1f0   : > { %v2015_v1 = vpack.c.bf16 %v1953_v48, %v1951_v11 }
 0x1f1   : > { %v2016_v63 = vpack.c.bf16 %v1954_v12, %v1952_v47  ;;  %v1802_v57 = vpop.f32.mrb[4].mxu0 }
 0x1f2   : > { %v2847_v3 = vadd.f32 %v1802_v57, %v4155_v20  ;;  %v1804_v60 = vpop.f32.mrb[5].mxu0 }
 0x1f3   : > { %v2848_v15 = vadd.f32 %v1804_v60, %v4157_v5  ;;  %v1806_v58 = vpop.f32.mrb[6].mxu0  ;;  %2271 = vmatprep.mubr.bf16.mxu1 %v2016_v63  ;;  %v4324_v5 = vpop.f32.mrb[62].mxu1 }
 0x1f4   : > { %v2849_v61 = vadd.f32 %v1806_v58, %v4159_v21  ;;  %v1808_v62 = vpop.f32.mrb[7].mxu0  ;;  %2272 = vmatmul.mubr.bf16.vlgmr.msra.gmra.mrb[64].mxu1 %v2015_v1  ;;  %v1955_v48 = vmax.f32 %v2847_v3, 0.0  ;;  %v4327_v60 = vpop.f32.mrb[63].mxu1 }
 0x1f5   : > { %v2850_v11 = vadd.f32 %v1808_v62, %v4161_v24  ;;  %v1956_v12 = vmax.f32 %v2848_v15, 0.0 }
 0x1f6   : > { %v1957_v47 = vmax.f32 %v2849_v61, 0.0 }
 0x1f7   : > { %v1958_v13 = vmax.f32 %v2850_v11, 0.0 }
 0x1f8   : > { %v2017_v20 = vpack.c.bf16 %v1957_v47, %v1955_v48 }
 0x1f9   : > { %v2018_v57 = vpack.c.bf16 %v1958_v13, %v1956_v12  ;;  %v1812_v4 = vpop.f32.mrb[8].mxu0 }
 0x1fa   : > { %v2851_v63 = vadd.f32 %v1812_v4, %v4167_v25  ;;  %v1814_v21 = vpop.f32.mrb[9].mxu0 }
 0x1fb   : > { %v2852_v24 = vadd.f32 %v1814_v21, %v4169_v28  ;;  %v1816_v1 = vpop.f32.mrb[10].mxu0  ;;  %2281 = vmatprep.mubr.bf16.mxu1 %v2018_v57 }
 0x1fc   : > { %v2853_v3 = vadd.f32 %v1816_v1, %v4171_v29  ;;  %v1818_v15 = vpop.f32.mrb[11].mxu0  ;;  %2282 = vmatmul.mubr.bf16.gmra.mrb[68].mxu1 %v2017_v20  ;;  %v1959_v61 = vmax.f32 %v2851_v63, 0.0 }
 0x1fd   : > { %v2854_v58 = vadd.f32 %v1818_v15, %v4173_v30  ;;  %v1960_v11 = vmax.f32 %v2852_v24, 0.0 }
 0x1fe   : > { %v1961_v62 = vmax.f32 %v2853_v3, 0.0 }
 0x1ff   : > { %v1962_v48 = vmax.f32 %v2854_v58, 0.0 }
 0x200   : > { %v2019_v47 = vpack.c.bf16 %v1961_v62, %v1959_v61 }
 0x201   : > { %v2020_v12 = vpack.c.bf16 %v1962_v48, %v1960_v11  ;;  %v1822_v25 = vpop.f32.mrb[12].mxu0 }
 0x202   : > { %v2855_v4 = vadd.f32 %v1822_v25, %v4179_v33  ;;  %v1824_v13 = vpop.f32.mrb[13].mxu0 }
 0x203   : > { %v2856_v28 = vadd.f32 %v1824_v13, %v4181_v8  ;;  %v1826_v21 = vpop.f32.mrb[14].mxu0  ;;  %2291 = vmatprep.mubr.bf16.mxu1 %v2020_v12 }
 0x204   : > { %v2857_v29 = vadd.f32 %v1826_v21, %v4183_v35  ;;  %v1828_v57 = vpop.f32.mrb[15].mxu0  ;;  %2292 = vmatmul.mubr.bf16.gmra.mrb[72].mxu1 %v2019_v47  ;;  %v1963_v20 = vmax.f32 %v2855_v4, 0.0 }
 0x205   : > { %v2858_v30 = vadd.f32 %v1828_v57, %v4185_v37  ;;  %v1964_v24 = vmax.f32 %v2856_v28, 0.0 }
 0x206   : > { %v1965_v63 = vmax.f32 %v2857_v29, 0.0 }
 0x207   : > { %v1966_v1 = vmax.f32 %v2858_v30, 0.0 }
 0x208   : > { %v2021_v3 = vpack.c.bf16 %v1965_v63, %v1963_v20 }
 0x209   : > { %v2022_v15 = vpack.c.bf16 %v1966_v1, %v1964_v24  ;;  %v1832_v58 = vpop.f32.mrb[16].mxu0 }
 0x20a   : > { %v2859_v33 = vadd.f32 %v1832_v58, %v4191_v41  ;;  %v1834_v61 = vpop.f32.mrb[17].mxu0 }
 0x20b   : > { %v2860_v8 = vadd.f32 %v1834_v61, %v4193_v42  ;;  %v1836_v62 = vpop.f32.mrb[18].mxu0  ;;  %2301 = vmatprep.mubr.bf16.mxu1 %v2022_v15 }
 0x20c   : > { %v2861_v35 = vadd.f32 %v1836_v62, %v4195_v39  ;;  %v1838_v11 = vpop.f32.mrb[19].mxu0  ;;  %2302 = vmatmul.mubr.bf16.gmra.mrb[76].mxu1 %v2021_v3  ;;  %v1967_v48 = vmax.f32 %v2859_v33, 0.0 }
 0x20d   : > { %v2862_v37 = vadd.f32 %v1838_v11, %v4197_v40  ;;  %v1968_v12 = vmax.f32 %v2860_v8, 0.0 }
 0x20e   : > { %v1969_v47 = vmax.f32 %v2861_v35, 0.0 }
 0x20f   : > { %v1970_v25 = vmax.f32 %v2862_v37, 0.0 }
 0x210   : > { %v2023_v4 = vpack.c.bf16 %v1969_v47, %v1967_v48 }
 0x211   : > { %v2024_v13 = vpack.c.bf16 %v1970_v25, %v1968_v12  ;;  %v1842_v28 = vpop.f32.mrb[20].mxu0 }
 0x212   : > { %v2863_v41 = vadd.f32 %v1842_v28, %v4203_v10  ;;  %v1844_v21 = vpop.f32.mrb[21].mxu0 }
 0x213   : > { %v2864_v42 = vadd.f32 %v1844_v21, %v4205_v43  ;;  %v1846_v29 = vpop.f32.mrb[22].mxu0  ;;  %2311 = vmatprep.mubr.bf16.mxu1 %v2024_v13 }
 0x214   : > { %v2865_v39 = vadd.f32 %v1846_v29, %v4207_v49  ;;  %v1848_v57 = vpop.f32.mrb[23].mxu0  ;;  %2312 = vmatmul.mubr.bf16.gmra.mrb[80].mxu1 %v2023_v4  ;;  %v1971_v30 = vmax.f32 %v2863_v41, 0.0 }
 0x215   : > { %v2866_v40 = vadd.f32 %v1848_v57, %v4209_v0  ;;  %v1972_v63 = vmax.f32 %v2864_v42, 0.0 }
 0x216   : > { %v1973_v20 = vmax.f32 %v2865_v39, 0.0 }
 0x217   : > { %v1974_v24 = vmax.f32 %v2866_v40, 0.0 }
 0x218   : > { %v2025_v1 = vpack.c.bf16 %v1973_v20, %v1971_v30 }
 0x219   : > { %v2026_v3 = vpack.c.bf16 %v1974_v24, %v1972_v63  ;;  %v1852_v15 = vpop.f32.mrb[24].mxu0 }
 0x21a   : > { %v2867_v10 = vadd.f32 %v1852_v15, %v4224_v55  ;;  %v1854_v58 = vpop.f32.mrb[25].mxu0 }
 0x21b   : > { %v2868_v43 = vadd.f32 %v1854_v58, %v4229_v51  ;;  %v1856_v33 = vpop.f32.mrb[26].mxu0  ;;  %2321 = vmatprep.mubr.bf16.mxu1 %v2026_v3 }
 0x21c   : > { %v2869_v49 = vadd.f32 %v1856_v33, %v4231_v56  ;;  %v1858_v61 = vpop.f32.mrb[27].mxu0  ;;  %2322 = vmatmul.mubr.bf16.gmra.mrb[84].mxu1 %v2025_v1  ;;  %v1975_v8 = vmax.f32 %v2867_v10, 0.0 }
 0x21d   : > { %v2870_v0 = vadd.f32 %v1858_v61, %v4233_v52  ;;  %v1976_v35 = vmax.f32 %v2868_v43, 0.0 }
 0x21e   : > { %v1977_v62 = vmax.f32 %v2869_v49, 0.0 }
 0x21f   : > { %v1978_v11 = vmax.f32 %v2870_v0, 0.0 }
 0x220   : > { %v2027_v37 = vpack.c.bf16 %v1977_v62, %v1975_v8 }
 0x221   : > { %v2028_v48 = vpack.c.bf16 %v1978_v11, %v1976_v35  ;;  %v1862_v47 = vpop.f32.mrb[28].mxu0 }
 0x222   : > { %v2871_v55 = vadd.f32 %v1862_v47, %v4239_v16  ;;  %v1864_v12 = vpop.f32.mrb[29].mxu0 }
 0x223   : > { %v2872_v51 = vadd.f32 %v1864_v12, %v4241_v59  ;;  %v1866_v25 = vpop.f32.mrb[30].mxu0  ;;  %2331 = vmatprep.mubr.bf16.mxu1 %v2028_v48 }
 0x224   : > { %v2873_v56 = vadd.f32 %v1866_v25, %v4243_v2  ;;  %v1868_v4 = vpop.f32.mrb[31].mxu0  ;;  %2332 = vmatmul.mubr.bf16.gmra.mrb[88].mxu1 %v2027_v37  ;;  %v1979_v13 = vmax.f32 %v2871_v55, 0.0 }
 0x225   : > { %v2874_v52 = vadd.f32 %v1868_v4, %v4245_v53  ;;  %v1980_v41 = vmax.f32 %v2872_v51, 0.0 }
 0x226   : > { %v1981_v28 = vmax.f32 %v2873_v56, 0.0 }
 0x227   : > { %v1982_v21 = vmax.f32 %v2874_v52, 0.0 }
 0x228   : > { %v2029_v42 = vpack.c.bf16 %v1981_v28, %v1979_v13 }
 0x229   : > { %v2030_v29 = vpack.c.bf16 %v1982_v21, %v1980_v41  ;;  %v1872_v39 = vpop.f32.mrb[32].mxu0 }
 0x22a   : > { %v2875_v16 = vadd.f32 %v1872_v39, %v4256_v17  ;;  %v1874_v57 = vpop.f32.mrb[33].mxu0 }
 0x22b   : > { %v2876_v59 = vadd.f32 %v1874_v57, %v4258_v19  ;;  %v1876_v40 = vpop.f32.mrb[34].mxu0  ;;  %2341 = vmatprep.mubr.bf16.mxu1 %v2030_v29 }
 0x22c   : > { %v2877_v2 = vadd.f32 %v1876_v40, %v4260_v26  ;;  %v1878_v30 = vpop.f32.mrb[35].mxu0  ;;  %2342 = vmatmul.mubr.bf16.gmra.mrb[92].mxu1 %v2029_v42  ;;  %v1983_v20 = vmax.f32 %v2875_v16, 0.0  ;;  %v4531_v40 = vld [vmem:[#allocation5_spill] sm:$0xff] }
 0x22d   : > { %v2878_v53 = vadd.f32 %v1878_v30, %v4262_v27  ;;  %v1984_v24 = vmax.f32 %v2876_v59, 0.0  ;;  %v4532_v30 = vld [vmem:[#allocation6_spill] sm:$0xff] }
 0x22e   : > { %v1985_v63 = vmax.f32 %v2877_v2, 0.0 }
 0x22f   : > { %v1986_v1 = vmax.f32 %v2878_v53, 0.0 }
 0x230   : > { %v2031_v3 = vpack.c.bf16 %v1985_v63, %v1983_v20  ;;  %v4533_v20 = vld [vmem:[#allocation7_spill] sm:$0xff] }
 0x231   : > { %v2032_v15 = vpack.c.bf16 %v1986_v1, %v1984_v24  ;;  %v1882_v10 = vpop.f32.mrb[36].mxu0  ;;  %v4534_v24 = vld [vmem:[#allocation8_spill] sm:$0xff] }
 0x232   : > { %v2879_v17 = vadd.f32 %v1882_v10, %v4264_v6  ;;  %v1884_v58 = vpop.f32.mrb[37].mxu0 }
 0x233   : > { %v2880_v19 = vadd.f32 %v1884_v58, %v4266_v31  ;;  %v1886_v43 = vpop.f32.mrb[38].mxu0  ;;  %2351 = vmatprep.mubr.bf16.mxu1 %v2032_v15 }
 0x234   : > { %v2881_v26 = vadd.f32 %v1886_v43, %v4268_v32  ;;  %v1888_v33 = vpop.f32.mrb[39].mxu0  ;;  %2352 = vmatmul.mubr.bf16.gmra.mrb[96].mxu1 %v2031_v3  ;;  %v1987_v49 = vmax.f32 %v2879_v17, 0.0  ;;  %v4535_v43 = vld [vmem:[#allocation9_spill] sm:$0xff] }
 0x235   : > { %v2882_v27 = vadd.f32 %v1888_v33, %v4270_v23  ;;  %v1988_v0 = vmax.f32 %v2880_v19, 0.0 }
 0x236   : > { %v1989_v61 = vmax.f32 %v2881_v26, 0.0 }
 0x237   : > { %v1990_v8 = vmax.f32 %v2882_v27, 0.0  ;;  %v4536_v27 = vld [vmem:[#allocation10_spill] sm:$0xff] }
 0x238   : > { %v2033_v62 = vpack.c.bf16 %v1989_v61, %v1987_v49 }
 0x239   : > { %v2034_v35 = vpack.c.bf16 %v1990_v8, %v1988_v0  ;;  %v1892_v11 = vpop.f32.mrb[40].mxu0  ;;  %v4537_v0 = vld [vmem:[#allocation11_spill] sm:$0xff] }
 0x23a   : > { %v2883_v6 = vadd.f32 %v1892_v11, %v4272_v7  ;;  %v1894_v37 = vpop.f32.mrb[41].mxu0 }
 0x23b   : > { %v2884_v31 = vadd.f32 %v1894_v37, %v4274_v34  ;;  %v1896_v48 = vpop.f32.mrb[42].mxu0  ;;  %2361 = vmatprep.mubr.bf16.mxu1 %v2034_v35  ;;  %v4538_v35 = vld [vmem:[#allocation12_spill] sm:$0xff] }
 0x23c   : > { %v2885_v32 = vadd.f32 %v1896_v48, %v4276_v36  ;;  %v1898_v47 = vpop.f32.mrb[43].mxu0  ;;  %2362 = vmatmul.mubr.bf16.gmra.mrb[100].mxu1 %v2033_v62  ;;  %v1991_v55 = vmax.f32 %v2883_v6, 0.0 }
 0x23d   : > { %v2886_v23 = vadd.f32 %v1898_v47, %v4278_v38  ;;  %v1992_v51 = vmax.f32 %v2884_v31, 0.0 }
 0x23e   : > { %v1993_v12 = vmax.f32 %v2885_v32, 0.0 }
 0x23f   : > { %v1994_v25 = vmax.f32 %v2886_v23, 0.0 }
 0x240   : > { %v2035_v56 = vpack.c.bf16 %v1993_v12, %v1991_v55 }
 0x241   : > { %v2036_v4 = vpack.c.bf16 %v1994_v25, %v1992_v51  ;;  %v1902_v52 = vpop.f32.mrb[44].mxu0 }
 0x242   : > { %v2887_v7 = vadd.f32 %v1902_v52, %v4280_v9  ;;  %v1904_v13 = vpop.f32.mrb[45].mxu0  ;;  %v4539_v52 = vld [vmem:[#allocation13_spill] sm:$0xff] }
 0x243   : > { %v2888_v34 = vadd.f32 %v1904_v13, %v4282_v45  ;;  %v1906_v28 = vpop.f32.mrb[46].mxu0  ;;  %2371 = vmatprep.mubr.bf16.mxu1 %v2036_v4 }
 0x244   : > { %v2889_v36 = vadd.f32 %v1906_v28, %v4284_v46  ;;  %v1908_v41 = vpop.f32.mrb[47].mxu0  ;;  %2372 = vmatmul.mubr.bf16.gmra.mrb[104].mxu1 %v2035_v56  ;;  %v1995_v21 = vmax.f32 %v2887_v7, 0.0 }
 0x245   : > { %v2890_v38 = vadd.f32 %v1908_v41, %v4286_v44  ;;  %v1996_v29 = vmax.f32 %v2888_v34, 0.0 }
 0x246   : > { %v1997_v42 = vmax.f32 %v2889_v36, 0.0 }
 0x247   : > { %v1998_v39 = vmax.f32 %v2890_v38, 0.0 }
 0x248   : > { %v2037_v16 = vpack.c.bf16 %v1997_v42, %v1995_v21 }
 0x249   : > { %v2038_v57 = vpack.c.bf16 %v1998_v39, %v1996_v29  ;;  %v1912_v59 = vpop.f32.mrb[48].mxu0 }
 0x24a   : > { %v2891_v9 = vadd.f32 %v1912_v59, %v4531_v40  ;;  %v1914_v2 = vpop.f32.mrb[49].mxu0 }
 0x24b   : > { %v2892_v45 = vadd.f32 %v1914_v2, %v4532_v30  ;;  %v1916_v53 = vpop.f32.mrb[50].mxu0  ;;  %2381 = vmatprep.mubr.bf16.mxu1 %v2038_v57 }
 0x24c   : > { %v2893_v46 = vadd.f32 %v1916_v53, %v4533_v20  ;;  %v1918_v63 = vpop.f32.mrb[51].mxu0  ;;  %2382 = vmatmul.mubr.bf16.gmra.mrb[108].mxu1 %v2037_v16  ;;  %v1999_v1 = vmax.f32 %v2891_v9, 0.0 }
 0x24d   : > { %v2894_v44 = vadd.f32 %v1918_v63, %v4534_v24  ;;  %v2000_v15 = vmax.f32 %v2892_v45, 0.0 }
 0x24e   : > { %v2001_v3 = vmax.f32 %v2893_v46, 0.0 }
 0x24f   : > { %v2002_v10 = vmax.f32 %v2894_v44, 0.0 }
 0x250   : > { %v2039_v17 = vpack.c.bf16 %v2001_v3, %v1999_v1 }
 0x251   : > { %v2040_v58 = vpack.c.bf16 %v2002_v10, %v2000_v15  ;;  %v1922_v19 = vpop.f32.mrb[52].mxu0 }
 0x252   : > { %v2895_v26 = vadd.f32 %v1922_v19, %v4535_v43  ;;  %v1924_v33 = vpop.f32.mrb[53].mxu0 }
 0x253   : > { %v2896_v49 = vadd.f32 %v1924_v33, %v4536_v27  ;;  %v1926_v61 = vpop.f32.mrb[54].mxu0  ;;  %2391 = vmatprep.mubr.bf16.mxu1 %v2040_v58 }
 0x254   : > { %v2897_v8 = vadd.f32 %v1926_v61, %v4537_v0  ;;  %v1928_v62 = vpop.f32.mrb[55].mxu0  ;;  %2392 = vmatmul.mubr.bf16.gmra.mrb[112].mxu1 %v2039_v17  ;;  %v2003_v6 = vmax.f32 %v2895_v26, 0.0 }
 0x255   : > { %v2898_v11 = vadd.f32 %v1928_v62, %v4538_v35  ;;  %v2004_v31 = vmax.f32 %v2896_v49, 0.0 }
 0x256   : > { %v2005_v37 = vmax.f32 %v2897_v8, 0.0 }
 0x257   : > { %v2006_v48 = vmax.f32 %v2898_v11, 0.0 }
 0x258   : > { %v2041_v32 = vpack.c.bf16 %v2005_v37, %v2003_v6 }
 0x259   : > { %v2042_v47 = vpack.c.bf16 %v2006_v48, %v2004_v31  ;;  %v1932_v23 = vpop.f32.mrb[56].mxu0 }
 0x25a   : > { %v2899_v55 = vadd.f32 %v1932_v23, %v4308_v54  ;;  %v1934_v12 = vpop.f32.mrb[57].mxu0 }
 0x25b   : > { %v2900_v51 = vadd.f32 %v1934_v12, %v4310_v50  ;;  %v1936_v25 = vpop.f32.mrb[58].mxu0  ;;  %2401 = vmatprep.mubr.bf16.mxu1 %v2042_v47 }
 0x25c   : > { %v2901_v56 = vadd.f32 %v1936_v25, %v4312_v18  ;;  %v1938_v4 = vpop.f32.mrb[59].mxu0  ;;  %2402 = vmatmul.mubr.bf16.gmra.mrb[116].mxu1 %v2041_v32  ;;  %v2007_v13 = vmax.f32 %v2899_v55, 0.0 }
 0x25d   : > { %v2902_v7 = vadd.f32 %v1938_v4, %v4539_v52  ;;  %v2008_v28 = vmax.f32 %v2900_v51, 0.0 }
 0x25e   : > { %v2009_v34 = vmax.f32 %v2901_v56, 0.0 }
 0x25f   : > { %v2010_v36 = vmax.f32 %v2902_v7, 0.0 }
 0x260   : > { %v2043_v41 = vpack.c.bf16 %v2009_v34, %v2007_v13 }
 0x261   : > { %v2044_v38 = vpack.c.bf16 %v2010_v36, %v2008_v28  ;;  %v1942_v21 = vpop.f32.mrb[60].mxu0 }
 0x262   : > { %v2903_v54 = vadd.f32 %v1942_v21, %v4320_v22  ;;  %v1944_v42 = vpop.f32.mrb[61].mxu0 }
 0x263   : > { %v2904_v50 = vadd.f32 %v1944_v42, %v4322_v14  ;;  %v1946_v29 = vpop.f32.mrb[62].mxu0  ;;  %2411 = vmatprep.mubr.bf16.mxu1 %v2044_v38 }
 0x264   : > { %v2905_v18 = vadd.f32 %v1946_v29, %v4324_v5  ;;  %v1948_v39 = vpop.f32.mrb[63].mxu0  ;;  %2412 = vmatmul.mubr.bf16.gmra.mrb[120].mxu1 %v2043_v41  ;;  %v2011_v57 = vmax.f32 %v2903_v54, 0.0 }
 0x265   : > { %v2906_v16 = vadd.f32 %v1948_v39, %v4327_v60  ;;  %v2012_v40 = vmax.f32 %v2904_v50, 0.0 }
 0x266   : > { %v2013_v59 = vmax.f32 %v2905_v18, 0.0 }
 0x267   : > { %v2014_v9 = vmax.f32 %v2906_v16, 0.0 }
 0x268   : > { %v2045_v2 = vpack.c.bf16 %v2013_v59, %v2011_v57 }
 0x269   : > { %v2046_v30 = vpack.c.bf16 %v2014_v9, %v2012_v40 }
 0x26b   : > { %2421 = vmatprep.mubr.bf16.mxu1 %v2046_v30 }
 0x26c   : > { %2422 = vmatmul.mubr.bf16.gmra.mrb[124].mxu1 %v2045_v2 }
 0x2c7   : > { %v2273_v22 = vpop.f32.mrb[64].mxu1 }
 0x2c8   : > { %v2432_v14 = vmax.f32 %v2273_v22, 0.0  ;;  %v2275_v45 = vpop.f32.mrb[65].mxu1 }
 0x2c9   : > { %v2433_v53 = vmax.f32 %v2275_v45, 0.0  ;;  %v2277_v5 = vpop.f32.mrb[66].mxu1 }
 0x2ca   : > { %2496 = vst [vmem:[%s4387_s5] sm:$0xff] %v2432_v14  ;;  %v2434_v60 = vmax.f32 %v2277_v5, 0.0  ;;  %v2279_v20 = vpop.f32.mrb[67].mxu1 }
 0x2cb   : > { %2497 = vst [vmem:[%s4387_s5 + $0x8] sm:$0xff] %v2433_v53  ;;  %v2435_v46 = vmax.f32 %v2279_v20, 0.0 }
 0x2cc   : > { %2498 = vst [vmem:[%s4387_s5 + $0x10] sm:$0xff] %v2434_v60 }
 0x2cd   : > { %2499 = vst [vmem:[%s4387_s5 + $0x18] sm:$0xff] %v2435_v46 }
 0x2cf   : > { %v2283_v63 = vpop.f32.mrb[68].mxu1 }
 0x2d0   : > { %v2436_v24 = vmax.f32 %v2283_v63, 0.0  ;;  %v2285_v44 = vpop.f32.mrb[69].mxu1 }
 0x2d1   : > { %v2437_v1 = vmax.f32 %v2285_v44, 0.0  ;;  %v2287_v3 = vpop.f32.mrb[70].mxu1 }
 0x2d2   : > { %2500 = vst [vmem:[%s4387_s5 + $0x20] sm:$0xff] %v2436_v24  ;;  %v2438_v15 = vmax.f32 %v2287_v3, 0.0  ;;  %v2289_v10 = vpop.f32.mrb[71].mxu1 }
 0x2d3   : > { %2501 = vst [vmem:[%s4387_s5 + $0x28] sm:$0xff] %v2437_v1  ;;  %v2439_v17 = vmax.f32 %v2289_v10, 0.0 }
 0x2d4   : > { %2502 = vst [vmem:[%s4387_s5 + $0x30] sm:$0xff] %v2438_v15 }
 0x2d5   : > { %2503 = vst [vmem:[%s4387_s5 + $0x38] sm:$0xff] %v2439_v17 }
 0x2d7   : > { %v2293_v58 = vpop.f32.mrb[72].mxu1 }
 0x2d8   : > { %v2440_v19 = vmax.f32 %v2293_v58, 0.0  ;;  %v2295_v43 = vpop.f32.mrb[73].mxu1 }
 0x2d9   : > { %v2441_v26 = vmax.f32 %v2295_v43, 0.0  ;;  %v2297_v33 = vpop.f32.mrb[74].mxu1 }
 0x2da   : > { %2504 = vst [vmem:[%s4387_s5 + $0x40] sm:$0xff] %v2440_v19  ;;  %v2442_v27 = vmax.f32 %v2297_v33, 0.0  ;;  %v2299_v49 = vpop.f32.mrb[75].mxu1 }
 0x2db   : > { %2505 = vst [vmem:[%s4387_s5 + $0x48] sm:$0xff] %v2441_v26  ;;  %v2443_v61 = vmax.f32 %v2299_v49, 0.0 }
 0x2dc   : > { %2506 = vst [vmem:[%s4387_s5 + $0x50] sm:$0xff] %v2442_v27 }
 0x2dd   : > { %2507 = vst [vmem:[%s4387_s5 + $0x58] sm:$0xff] %v2443_v61 }
 0x2df   : > { %v2303_v0 = vpop.f32.mrb[76].mxu1 }
 0x2e0   : > { %v2444_v8 = vmax.f32 %v2303_v0, 0.0  ;;  %v2305_v62 = vpop.f32.mrb[77].mxu1 }
 0x2e1   : > { %v2445_v35 = vmax.f32 %v2305_v62, 0.0  ;;  %v2307_v11 = vpop.f32.mrb[78].mxu1 }
 0x2e2   : > { %2508 = vst [vmem:[%s4387_s5 + $0x60] sm:$0xff] %v2444_v8  ;;  %v2446_v6 = vmax.f32 %v2307_v11, 0.0  ;;  %v2309_v37 = vpop.f32.mrb[79].mxu1 }
 0x2e3   : > { %2509 = vst [vmem:[%s4387_s5 + $0x68] sm:$0xff] %v2445_v35  ;;  %v2447_v31 = vmax.f32 %v2309_v37, 0.0 }
 0x2e4   : > { %2510 = vst [vmem:[%s4387_s5 + $0x70] sm:$0xff] %v2446_v6 }
 0x2e5   : > { %2511 = vst [vmem:[%s4387_s5 + $0x78] sm:$0xff] %v2447_v31 }
 0x2e7   : > { %v2313_v48 = vpop.f32.mrb[80].mxu1 }
 0x2e8   : > { %v2448_v32 = vmax.f32 %v2313_v48, 0.0  ;;  %v2315_v47 = vpop.f32.mrb[81].mxu1 }
 0x2e9   : > { %v2449_v23 = vmax.f32 %v2315_v47, 0.0  ;;  %v2317_v55 = vpop.f32.mrb[82].mxu1 }
 0x2ea   : > { %2512 = vst [vmem:[%s4387_s5 + $0x80] sm:$0xff] %v2448_v32  ;;  %v2450_v12 = vmax.f32 %v2317_v55, 0.0  ;;  %v2319_v51 = vpop.f32.mrb[83].mxu1 }
 0x2eb   : > { %2513 = vst [vmem:[%s4387_s5 + $0x88] sm:$0xff] %v2449_v23  ;;  %v2451_v25 = vmax.f32 %v2319_v51, 0.0 }
 0x2ec   : > { %2514 = vst [vmem:[%s4387_s5 + $0x90] sm:$0xff] %v2450_v12 }
 0x2ed   : > { %2515 = vst [vmem:[%s4387_s5 + $0x98] sm:$0xff] %v2451_v25 }
 0x2ef   : > { %v2323_v56 = vpop.f32.mrb[84].mxu1 }
 0x2f0   : > { %v2452_v4 = vmax.f32 %v2323_v56, 0.0  ;;  %v2325_v52 = vpop.f32.mrb[85].mxu1 }
 0x2f1   : > { %v2453_v7 = vmax.f32 %v2325_v52, 0.0  ;;  %v2327_v13 = vpop.f32.mrb[86].mxu1 }
 0x2f2   : > { %2516 = vst [vmem:[%s4387_s5 + $0xa0] sm:$0xff] %v2452_v4  ;;  %v2454_v34 = vmax.f32 %v2327_v13, 0.0  ;;  %v2329_v28 = vpop.f32.mrb[87].mxu1 }
 0x2f3   : > { %2517 = vst [vmem:[%s4387_s5 + $0xa8] sm:$0xff] %v2453_v7  ;;  %v2455_v36 = vmax.f32 %v2329_v28, 0.0 }
 0x2f4   : > { %2518 = vst [vmem:[%s4387_s5 + $0xb0] sm:$0xff] %v2454_v34 }
 0x2f5   : > { %2519 = vst [vmem:[%s4387_s5 + $0xb8] sm:$0xff] %v2455_v36 }
 0x2f7   : > { %v2333_v41 = vpop.f32.mrb[88].mxu1 }
 0x2f8   : > { %v2456_v38 = vmax.f32 %v2333_v41, 0.0  ;;  %v2335_v21 = vpop.f32.mrb[89].mxu1 }
 0x2f9   : > { %v2457_v54 = vmax.f32 %v2335_v21, 0.0  ;;  %v2337_v42 = vpop.f32.mrb[90].mxu1 }
 0x2fa   : > { %2520 = vst [vmem:[%s4387_s5 + $0xc0] sm:$0xff] %v2456_v38  ;;  %v2458_v50 = vmax.f32 %v2337_v42, 0.0  ;;  %v2339_v29 = vpop.f32.mrb[91].mxu1 }
 0x2fb   : > { %2521 = vst [vmem:[%s4387_s5 + $0xc8] sm:$0xff] %v2457_v54  ;;  %v2459_v18 = vmax.f32 %v2339_v29, 0.0 }
 0x2fc   : > { %2522 = vst [vmem:[%s4387_s5 + $0xd0] sm:$0xff] %v2458_v50 }
 0x2fd   : > { %2523 = vst [vmem:[%s4387_s5 + $0xd8] sm:$0xff] %v2459_v18 }
 0x2ff   : > { %v2343_v39 = vpop.f32.mrb[92].mxu1 }
 0x300   : > { %v2460_v16 = vmax.f32 %v2343_v39, 0.0  ;;  %v2345_v57 = vpop.f32.mrb[93].mxu1 }
 0x301   : > { %v2461_v59 = vmax.f32 %v2345_v57, 0.0  ;;  %v2347_v40 = vpop.f32.mrb[94].mxu1 }
 0x302   : > { %2524 = vst [vmem:[%s4387_s5 + $0xe0] sm:$0xff] %v2460_v16  ;;  %v2462_v9 = vmax.f32 %v2347_v40, 0.0  ;;  %v2349_v2 = vpop.f32.mrb[95].mxu1 }
 0x303   : > { %2525 = vst [vmem:[%s4387_s5 + $0xe8] sm:$0xff] %v2461_v59  ;;  %v2463_v30 = vmax.f32 %v2349_v2, 0.0 }
 0x304   : > { %2526 = vst [vmem:[%s4387_s5 + $0xf0] sm:$0xff] %v2462_v9 }
 0x305   : > { %2527 = vst [vmem:[%s4387_s5 + $0xf8] sm:$0xff] %v2463_v30 }
 0x307   : > { %v2353_v22 = vpop.f32.mrb[96].mxu1 }
 0x308   : > { %v2464_v14 = vmax.f32 %v2353_v22, 0.0  ;;  %v2355_v45 = vpop.f32.mrb[97].mxu1 }
 0x309   : > { %v2465_v53 = vmax.f32 %v2355_v45, 0.0  ;;  %v2357_v5 = vpop.f32.mrb[98].mxu1 }
 0x30a   : > { %2528 = vst [vmem:[%s4387_s5 + $0x100] sm:$0xff] %v2464_v14  ;;  %v2466_v60 = vmax.f32 %v2357_v5, 0.0  ;;  %v2359_v20 = vpop.f32.mrb[99].mxu1 }
 0x30b   : > { %2529 = vst [vmem:[%s4387_s5 + $0x108] sm:$0xff] %v2465_v53  ;;  %v2467_v46 = vmax.f32 %v2359_v20, 0.0 }
 0x30c   : > { %2530 = vst [vmem:[%s4387_s5 + $0x110] sm:$0xff] %v2466_v60 }
 0x30d   : > { %2531 = vst [vmem:[%s4387_s5 + $0x118] sm:$0xff] %v2467_v46 }
 0x30f   : > { %v2363_v63 = vpop.f32.mrb[100].mxu1 }
 0x310   : > { %v2468_v24 = vmax.f32 %v2363_v63, 0.0  ;;  %v2365_v44 = vpop.f32.mrb[101].mxu1 }
 0x311   : > { %v2469_v1 = vmax.f32 %v2365_v44, 0.0  ;;  %v2367_v3 = vpop.f32.mrb[102].mxu1 }
 0x312   : > { %2532 = vst [vmem:[%s4387_s5 + $0x120] sm:$0xff] %v2468_v24  ;;  %v2470_v15 = vmax.f32 %v2367_v3, 0.0  ;;  %v2369_v10 = vpop.f32.mrb[103].mxu1 }
 0x313   : > { %2533 = vst [vmem:[%s4387_s5 + $0x128] sm:$0xff] %v2469_v1  ;;  %v2471_v17 = vmax.f32 %v2369_v10, 0.0 }
 0x314   : > { %2534 = vst [vmem:[%s4387_s5 + $0x130] sm:$0xff] %v2470_v15 }
 0x315   : > { %2535 = vst [vmem:[%s4387_s5 + $0x138] sm:$0xff] %v2471_v17 }
 0x317   : > { %v2373_v58 = vpop.f32.mrb[104].mxu1 }
 0x318   : > { %v2472_v19 = vmax.f32 %v2373_v58, 0.0  ;;  %v2375_v43 = vpop.f32.mrb[105].mxu1 }
 0x319   : > { %v2473_v26 = vmax.f32 %v2375_v43, 0.0  ;;  %v2377_v33 = vpop.f32.mrb[106].mxu1 }
 0x31a   : > { %2536 = vst [vmem:[%s4387_s5 + $0x140] sm:$0xff] %v2472_v19  ;;  %v2474_v27 = vmax.f32 %v2377_v33, 0.0  ;;  %v2379_v49 = vpop.f32.mrb[107].mxu1 }
 0x31b   : > { %2537 = vst [vmem:[%s4387_s5 + $0x148] sm:$0xff] %v2473_v26  ;;  %v2475_v61 = vmax.f32 %v2379_v49, 0.0 }
 0x31c   : > { %2538 = vst [vmem:[%s4387_s5 + $0x150] sm:$0xff] %v2474_v27 }
 0x31d   : > { %2539 = vst [vmem:[%s4387_s5 + $0x158] sm:$0xff] %v2475_v61 }
 0x31f   : > { %v2383_v0 = vpop.f32.mrb[108].mxu1 }
 0x320   : > { %v2476_v8 = vmax.f32 %v2383_v0, 0.0  ;;  %v2385_v62 = vpop.f32.mrb[109].mxu1 }
 0x321   : > { %v2477_v35 = vmax.f32 %v2385_v62, 0.0  ;;  %v2387_v11 = vpop.f32.mrb[110].mxu1 }
 0x322   : > { %2540 = vst [vmem:[%s4387_s5 + $0x160] sm:$0xff] %v2476_v8  ;;  %v2478_v6 = vmax.f32 %v2387_v11, 0.0  ;;  %v2389_v37 = vpop.f32.mrb[111].mxu1 }
 0x323   : > { %2541 = vst [vmem:[%s4387_s5 + $0x168] sm:$0xff] %v2477_v35  ;;  %v2479_v31 = vmax.f32 %v2389_v37, 0.0 }
 0x324   : > { %2542 = vst [vmem:[%s4387_s5 + $0x170] sm:$0xff] %v2478_v6 }
 0x325   : > { %2543 = vst [vmem:[%s4387_s5 + $0x178] sm:$0xff] %v2479_v31 }
 0x327   : > { %v2393_v48 = vpop.f32.mrb[112].mxu1 }
 0x328   : > { %v2480_v32 = vmax.f32 %v2393_v48, 0.0  ;;  %v2395_v47 = vpop.f32.mrb[113].mxu1 }
 0x329   : > { %v2481_v23 = vmax.f32 %v2395_v47, 0.0  ;;  %v2397_v55 = vpop.f32.mrb[114].mxu1 }
 0x32a   : > { %2544 = vst [vmem:[%s4387_s5 + $0x180] sm:$0xff] %v2480_v32  ;;  %v2482_v12 = vmax.f32 %v2397_v55, 0.0  ;;  %v2399_v51 = vpop.f32.mrb[115].mxu1 }
 0x32b   : > { %2545 = vst [vmem:[%s4387_s5 + $0x188] sm:$0xff] %v2481_v23  ;;  %v2483_v25 = vmax.f32 %v2399_v51, 0.0 }
 0x32c   : > { %2546 = vst [vmem:[%s4387_s5 + $0x190] sm:$0xff] %v2482_v12 }
 0x32d   : > { %2547 = vst [vmem:[%s4387_s5 + $0x198] sm:$0xff] %v2483_v25 }
 0x32f   : > { %v2403_v56 = vpop.f32.mrb[116].mxu1 }
 0x330   : > { %v2484_v4 = vmax.f32 %v2403_v56, 0.0  ;;  %v2405_v52 = vpop.f32.mrb[117].mxu1 }
 0x331   : > { %v2485_v7 = vmax.f32 %v2405_v52, 0.0  ;;  %v2407_v13 = vpop.f32.mrb[118].mxu1 }
 0x332   : > { %2548 = vst [vmem:[%s4387_s5 + $0x1a0] sm:$0xff] %v2484_v4  ;;  %v2486_v34 = vmax.f32 %v2407_v13, 0.0  ;;  %v2409_v28 = vpop.f32.mrb[119].mxu1 }
 0x333   : > { %2549 = vst [vmem:[%s4387_s5 + $0x1a8] sm:$0xff] %v2485_v7  ;;  %v2487_v36 = vmax.f32 %v2409_v28, 0.0 }
 0x334   : > { %2550 = vst [vmem:[%s4387_s5 + $0x1b0] sm:$0xff] %v2486_v34 }
 0x335   : > { %2551 = vst [vmem:[%s4387_s5 + $0x1b8] sm:$0xff] %v2487_v36 }
 0x337   : > { %v2413_v41 = vpop.f32.mrb[120].mxu1 }
 0x338   : > { %v2488_v38 = vmax.f32 %v2413_v41, 0.0  ;;  %v2415_v21 = vpop.f32.mrb[121].mxu1 }
 0x339   : > { %v2489_v54 = vmax.f32 %v2415_v21, 0.0  ;;  %v2417_v42 = vpop.f32.mrb[122].mxu1 }
 0x33a   : > { %2552 = vst [vmem:[%s4387_s5 + $0x1c0] sm:$0xff] %v2488_v38  ;;  %v2490_v50 = vmax.f32 %v2417_v42, 0.0  ;;  %v2419_v29 = vpop.f32.mrb[123].mxu1 }
 0x33b   : > { %2553 = vst [vmem:[%s4387_s5 + $0x1c8] sm:$0xff] %v2489_v54  ;;  %v2491_v18 = vmax.f32 %v2419_v29, 0.0 }
 0x33c   : > { %2554 = vst [vmem:[%s4387_s5 + $0x1d0] sm:$0xff] %v2490_v50 }
 0x33d   : > { %2555 = vst [vmem:[%s4387_s5 + $0x1d8] sm:$0xff] %v2491_v18 }
 0x33f   : > { %v2423_v39 = vpop.f32.mrb[124].mxu1  ;;  %2567 = sbr.rel (!%p3398_p5) target bundleno = 866 (0x362), region = 36 }
 0x340   : > { %v2492_v16 = vmax.f32 %v2423_v39, 0.0  ;;  %v2425_v57 = vpop.f32.mrb[125].mxu1 }
 0x341   : > { %v2493_v59 = vmax.f32 %v2425_v57, 0.0  ;;  %v2427_v40 = vpop.f32.mrb[126].mxu1 }
 0x342   : > { %2556 = vst [vmem:[%s4387_s5 + $0x1e0] sm:$0xff] %v2492_v16  ;;  %v2494_v9 = vmax.f32 %v2427_v40, 0.0  ;;  %v2429_v2 = vpop.f32.mrb[127].mxu1 }
 0x343   : > { %2557 = vst [vmem:[%s4387_s5 + $0x1e8] sm:$0xff] %v2493_v59  ;;  %v2495_v30 = vmax.f32 %v2429_v2, 0.0 }
 0x344   : > { %2558 = vst [vmem:[%s4387_s5 + $0x1f0] sm:$0xff] %v2494_v9 }
 0x345   : > { %2559 = vst [vmem:[%s4387_s5 + $0x1f8] sm:$0xff] %v2495_v30 }
 0x346   : > { %s4545_s8 = smov (!%p2570_p11, %s2569_s8), 32 }
 0x347   : > { %s4460_s10 = sshll.u32 %s4545_s8, 8 }
 0x348   : > { %s2575_s11 = ssub.s32 8192, %s4460_s10 }
 0x349   : > { %2576 = vsyncadd %s4455_s6, %s2575_s11  ;;  %p2801_p12 = scmp.ne.s32.totalorder %s4460_s10, 0  ;;  %s2810_s17 = sshll.u32 %s3381_s16, 13 }
 0x34a   : > { %s4469_s20 = scalar_lea.hbm %s4519_s3, %s2810_s17  ;;  %s2582_s7 = sshll.u32 %s4387_s5, 4  ;;  %s4472_s7 = int_to_ptr.vmem [resolvable:$true] %s2582_s7 }
 0x34b   : > { %s3272_s24 = scalar_lea.vmem %s4472_s7, %s4460_s10  ;;  %s3337_s25 = smov [#allocation2]  }
 0x34c   : > { %p3273_p13 = scmp.ne.s32.totalorder %s4472_s7, %s3272_s24  ;;  %s3276_s26 = sshll.u32 %s3337_s25, 4  ;;  %s3277_s26 = int_to_ptr.vmem [resolvable:$false] %s3276_s26 }
 0x34d   : > { %s3278_s16 = scalar_lea.vmem %s3277_s26, 16384  ;;  %p3279_p2 = scmp.lt.s32.totalorder %s4472_s7, %s3277_s26 }
 0x34e   : > { %p3274_p0 = pnand %p3273_p13, %p2801_p12  ;;  %p3280_p3 = scmp.lt.s32.totalorder %s3278_s16, %s3272_s24 }
 0x350   : > { %p3275_p1 = pneg %p3274_p0  ;;  %p3281_p4 = por %p3280_p3, %p3279_p2 }
 0x352   : > { %p3282_p5 = pnand %p3281_p4, %p3275_p1 }
 0x354   : > { %3285 = shalt.err (!%p3282_p5)
}
 0x355   : > { %s3286_s27 = scalar_lea.hbm %s4469_s20, %s4460_s10  ;;  %s3290_s30 = scalar_lea.hbm %s4519_s3, 16128 }
 0x356   : > { %p3287_p7 = scmp.ne.s32.totalorder %s4469_s20, %s3286_s27  ;;  %p3291_p10 = scmp.lt.u32.totalorder %s4469_s20, %s4519_s3 }
 0x357   : > { %p3292_p11 = scmp.lt.u32.totalorder %s3290_s30, %s3286_s27  ;;  %p3294_p0 = scmp.lt.u32.totalorder %s3286_s27, %s4469_s20 }
 0x358   : > { %p3288_p8 = pnand %p3287_p7, %p2801_p12 }
 0x359   : > { %p3293_p13 = por %p3292_p11, %p3291_p10 }
 0x35a   : > { %p3289_p9 = pneg %p3288_p8 }
 0x35b   : > { %p3295_p1 = por %p3294_p0, %p3293_p13 }
 0x35d   : > { %p3296_p2 = pnand %p3295_p1, %p3289_p9 }
 0x35f   : > { %3299 = shalt.err (!%p3296_p2)
}
 0x360   : > { %s3338_s5 = smov 256   ;;  %s3339_s8 = smov 16  }
 0x361   : > { %2588 = dma.vmem_to_hbm [thread:$0]  (%p2801_p12), %s4472_s7, %s4460_s10, %s4469_s20, %s4455_s6, %s3338_s5, %s3338_s5, %s3339_s8  }
 0x362 PF: > { %p3041_p3 = scmp.ge.s32.totalorder %s3334_s15, 2  ;;  %s2597_s11 = sand.u32 1, %s3322_s12  }
 0x363   : > { %s2598_s17 = scalar_lea.sflag [#allocation3], %s2597_s11 }
 0x364   : > { %p3038_p4 = pnand %p3041_p3, %p3402_p6 }
 0x366   : > { %3317 = dma.done.wait (!%p3038_p4), %s2598_s17, 8192  }
 0x367   : > { %3319 = vsyncadd (!%p3038_p4), %s2598_s17, 4294959104  ;;  %p13_p5 = scmp.ge.s32.totalorder %s3385_s18, 4   ;;  %s4540_s12 = smov %s3326_s13 }
 0x368   : > { %s4541_s13 = smov %s3330_s14  ;;  %s4542_s14 = smov %s3396_s21 }
 0x369   : > { %s4543_s15 = smov %s3385_s18  ;;  %15 = sbr.rel (!%p13_p5) target bundleno = 3 (0x3), region = 67 }
 0x370   :  { %2603 = vsyncpa [#allocation3], 1 }
 0x371   :  { %2605 = vsyncpa [#allocation3 + $0x1], 1 }

</bundles_post_ra>
